<compile_context>
chip_gen: v7x
topology: tpu7x:2x2x1
jax: 0.10.0
libtpu: 0.0.40
codegen_flags: <defaults>
</compile_context>

<pallas_src>
import math

import jax
import jax.numpy as jnp
from jax import lax
from jax.experimental import pallas as pl
from jax.experimental.pallas import tpu as pltpu


_LANES = 128     # lane width of a vreg
_CHUNK = 8       # sublanes per inner compute chunk (1 f32 vreg per temporary)
_ROW_MULT = 16   # block sublane-rows kept a multiple of 16 (bf16-safe tiling)


# ----------------------------- in-kernel math ------------------------------ #

def _rcp(x):
    return pl.reciprocal(x, approx=True)


def _sigmoid(x):
    return _rcp(1.0 + jnp.exp(-x))


def _atan(x):
    # Cephes atanf-style arctangent using only VPU/EUP ops (exact divides).
    sgn = jnp.where(x < 0.0, -1.0, 1.0)
    ax = jnp.abs(x)
    big = ax > 2.414213562373095     # tan(3*pi/8)
    mid = ax > 0.4142135623730950    # tan(pi/8)
    y0 = jnp.where(big, math.pi / 2.0, jnp.where(mid, math.pi / 4.0, 0.0))
    xr = jnp.where(
        big, -1.0 / jnp.maximum(ax, 1e-30),
        jnp.where(mid, (ax - 1.0) / (ax + 1.0), ax))
    z = xr * xr
    poly = ((((8.05374449538e-2 * z - 1.38776856032e-1) * z
              + 1.99777106478e-1) * z - 3.33329491539e-1) * z) * xr + xr
    return sgn * (y0 + poly)


def _ciou(px, py, pw, ph, tx, ty, tw, th, atan_t, eps=1e-7):
    """Complete-IoU between midpoint boxes; all args (8,128), returns (8,128).

    `atan_t` = arctan(tw / (th + eps)) precomputed in the wrapper.
    Exact division is used for all CIoU divides (precision review item).
    """
    b1x1, b1x2 = px - pw * 0.5, px + pw * 0.5
    b1y1, b1y2 = py - ph * 0.5, py + ph * 0.5
    b2x1, b2x2 = tx - tw * 0.5, tx + tw * 0.5
    b2y1, b2y2 = ty - th * 0.5, ty + th * 0.5

    inter_w = jnp.maximum(jnp.minimum(b1x2, b2x2) - jnp.maximum(b1x1, b2x1), 0.0)
    inter_h = jnp.maximum(jnp.minimum(b1y2, b2y2) - jnp.maximum(b1y1, b2y1), 0.0)
    inter = inter_w * inter_h
    union = pw * ph + tw * th - inter + eps
    iou = inter / union

    cw = jnp.maximum(b1x2, b2x2) - jnp.minimum(b1x1, b2x1)
    ch = jnp.maximum(b1y2, b2y2) - jnp.minimum(b1y1, b2y1)
    c2 = cw * cw + ch * ch + eps
    rho2 = ((b2x1 + b2x2 - b1x1 - b1x2) ** 2
            + (b2y1 + b2y2 - b1y1 - b1y2) ** 2) * 0.25
    v = (4.0 / (math.pi ** 2)) * (atan_t - _atan(pw / (ph + eps))) ** 2
    alpha = v / (v - iou + (1.0 + eps))
    return iou - (rho2 / c2 + v * alpha)


# --------------------------------- kernel ---------------------------------- #

def _make_kernel(num_classes, n_chunks):
    """Returns kernel(pred_ref, tgt_ref, anc_ref, out_ref).

    Block shapes: pred (1, 5+NC, tr, 128), tgt (1, 7, tr, 128),
    anc (1, 2, 1, 128), out (1, 1, 8, 128).  Rows 0..5 of the output block
    hold per-lane partial sums of
    [sum_bce_noobj, cnt_noobj, sum_(1-ciou)_obj, cnt_obj, sum_bce_obj, sum_ce_obj];
    the lane reduction is finished in JAX.
    """
    single_pass_ce = num_classes <= 16
    if n_chunks <= 4:
        unroll = True
    else:
        unroll = 4 if num_classes <= 8 else 2

    def kernel(pred_ref, tgt_ref, anc_ref, out_ref):
        # Hoisted anchor broadcast (JAX does not CSE broadcast_in_dim).
        anc_w = jnp.broadcast_to(anc_ref[0, 0, :, :].astype(jnp.float32),
                                 (_CHUNK, _LANES))
        anc_h = jnp.broadcast_to(anc_ref[0, 1, :, :].astype(jnp.float32),
                                 (_CHUNK, _LANES))

        def body(i, carry):
            acc_nobce, acc_ncnt, acc_box, acc_ocnt, acc_obce, acc_ce = carry
            r0 = pl.multiple_of(i * _CHUNK, _CHUNK)

            def pch(c):
                return pred_ref[0, c, pl.ds(r0, _CHUNK), :].astype(jnp.float32)

            def tch(c):
                return tgt_ref[0, c, pl.ds(r0, _CHUNK), :].astype(jnp.float32)

            # Padded cells were filled with obj = -1 ("ignore"), so no
            # explicit validity mask is needed.
            t_obj = tch(0)
            obj_b = t_obj == 1.0
            noobj_b = t_obj == 0.0

            # ----- shared BCE-with-logits softplus base -----
            # bce(x, y) = max(x,0) - x*y + log1p(exp(-|x|)) = base - x*y
            p_obj = pch(0)
            base = jnp.maximum(p_obj, 0.0) + jnp.log1p(jnp.exp(-jnp.abs(p_obj)))

            # no-object BCE (target is exactly 0 on no-object cells)
            acc_nobce = acc_nobce + jnp.where(noobj_b, base, 0.0)
            acc_ncnt = acc_ncnt + jnp.where(noobj_b, 1.0, 0.0)

            # ----- box predictions: [sigmoid(xy), exp(wh) * anchors] -----
            px = _sigmoid(pch(1))
            py = _sigmoid(pch(2))
            pw = jnp.exp(pch(3)) * anc_w
            ph = jnp.exp(pch(4)) * anc_h
            tx, ty, tw, th = tch(1), tch(2), tch(3), tch(4)
            atan_t = tch(6)          # precomputed arctan(tw/(th+eps))

            ciou = _ciou(px, py, pw, ph, tx, ty, tw, th, atan_t)
            acc_box = acc_box + jnp.where(obj_b, 1.0 - ciou, 0.0)
            acc_ocnt = acc_ocnt + jnp.where(obj_b, 1.0, 0.0)

            # object BCE with target = ciou * t_obj (t_obj == 1 on obj cells)
            acc_obce = acc_obce + jnp.where(obj_b, base - p_obj * ciou, 0.0)

            # ----- class cross-entropy (channel-major logits) -----
            t_cls = tch(5)
            if single_pass_ce:
                logits = [pch(5 + k) for k in range(num_classes)]
                mval = logits[0]
                for k in range(1, num_classes):
                    mval = jnp.maximum(mval, logits[k])
                sexp = jnp.zeros_like(mval)
                picked = jnp.zeros_like(mval)
                for k in range(num_classes):
                    lk = logits[k]
                    sexp = sexp + jnp.exp(lk - mval)
                    picked = picked + jnp.where(t_cls == float(k), lk, 0.0)
            else:
                # Large NC: two passes (bounded live vregs), each logit read twice.
                mval = pch(5)
                for k in range(1, num_classes):
                    mval = jnp.maximum(mval, pch(5 + k))
                sexp = jnp.zeros_like(mval)
                picked = jnp.zeros_like(mval)
                for k in range(num_classes):
                    lk = pch(5 + k)
                    sexp = sexp + jnp.exp(lk - mval)
                    picked = picked + jnp.where(t_cls == float(k), lk, 0.0)
            ce = mval + jnp.log(sexp) - picked
            acc_ce = acc_ce + jnp.where(obj_b, ce, 0.0)

            return (acc_nobce, acc_ncnt, acc_box, acc_ocnt, acc_obce, acc_ce)

        zeros = jnp.zeros((_CHUNK, _LANES), jnp.float32)
        accs = lax.fori_loop(0, n_chunks, body, (zeros,) * 6, unroll=unroll)

        # Cheap epilogue: sublane-only reduction; lanes are reduced in JAX.
        for k in range(6):
            out_ref[0, 0, pl.ds(k, 1), :] = jnp.sum(accs[k], axis=0,
                                                    keepdims=True)
        out_ref[0, 0, pl.ds(6, 2), :] = jnp.zeros((2, _LANES), jnp.float32)

    return kernel


# -------------------------------- wrapper ----------------------------------- #

def yolo_loss_pallas(predictions, target, anchors, *, block_rows=256):
    """block_rows = sublane rows (x128 lanes) per grid step (multiple of 16)."""
    N, A, S, S2, C = predictions.shape
    assert S == S2 and anchors.shape[0] == A and target.shape[-1] == 6
    num_classes = C - 5
    eps = 1e-7

    block_rows = max(_ROW_MULT, (block_rows // _ROW_MULT) * _ROW_MULT)

    Ma = N * S * S                                    # rows per anchor
    Ra = -(-Ma // _LANES)                             # sublane rows per anchor
    tr = min(block_rows, -(-Ra // _ROW_MULT) * _ROW_MULT)
    tr = max(tr, _ROW_MULT)
    Ra_p = -(-Ra // tr) * tr                          # padded sublane rows
    G = Ra_p // tr
    n_chunks = tr // _CHUNK

    # Anchor-major, channel-major, lane-dense layout in the *native* dtype
    # (no f32 upcast in the wrapper; the kernel casts per chunk).
    pred_t = jnp.transpose(predictions, (1, 4, 0, 2, 3)).reshape(A, C, Ma)

    # Target gets a 7th channel: arctan(tw / (th + eps)) (target-only math,
    # hoisted out of the kernel).
    tdt = target.dtype
    atan_t = jnp.arctan(target[..., 3].astype(jnp.float32)
                        / (target[..., 4].astype(jnp.float32) + eps))
    tgt7 = jnp.concatenate([target, atan_t[..., None].astype(tdt)], axis=-1)
    tgt_t = jnp.transpose(tgt7, (1, 4, 0, 2, 3)).reshape(A, 7, Ma)

    pad = Ra_p * _LANES - Ma
    if pad:
        pred_t = jnp.pad(pred_t, ((0, 0), (0, 0), (0, pad)))
        tgt_t = jnp.pad(tgt_t, ((0, 0), (0, 0), (0, pad)))
        # Padded cells are marked "ignore" (obj = -1) so no per-chunk validity
        # mask is needed inside the kernel.
        tgt_t = tgt_t.at[:, 0, Ma:].set(jnp.asarray(-1.0, tdt))
    pred4 = pred_t.reshape(A, C, Ra_p, _LANES)
    tgt4 = tgt_t.reshape(A, 7, Ra_p, _LANES)

    # Tiny per-anchor (w, h) slab broadcast over lanes: (A, 2, 1, 128).
    anc4 = jnp.broadcast_to(
        anchors.astype(jnp.float32).reshape(A, 2, 1, 1), (A, 2, 1, _LANES))

    kernel = _make_kernel(num_classes, n_chunks)

    # Explicit VMEM budget (v7x has only 64 MiB physical / 32 MiB default
    # scoped VMEM): double-buffered pred + tgt blocks + small extras.
    block_bytes = (C * tr * _LANES * pred4.dtype.itemsize
                   + 7 * tr * _LANES * tgt4.dtype.itemsize
                   + 2 * _LANES * 4 + 8 * _LANES * 4)
    vmem_limit = int(min(64 << 20, max(16 << 20, 2 * block_bytes + (8 << 20))))

    partials = pl.pallas_call(
        kernel,
        out_shape=jax.ShapeDtypeStruct((A, G, 8, _LANES), jnp.float32),
        grid_spec=pltpu.PrefetchScalarGridSpec(
            num_scalar_prefetch=0,
            grid=(A, G),
            in_specs=[
                pl.BlockSpec((1, C, tr, _LANES), lambda a, g: (a, 0, g, 0)),
                pl.BlockSpec((1, 7, tr, _LANES), lambda a, g: (a, 0, g, 0)),
                pl.BlockSpec((1, 2, 1, _LANES), lambda a, g: (a, 0, 0, 0)),
            ],
            out_specs=pl.BlockSpec((1, 1, 8, _LANES),
                                   lambda a, g: (a, g, 0, 0)),
        ),
        compiler_params=pltpu.CompilerParams(
            dimension_semantics=("parallel", "parallel"),
            vmem_limit_bytes=vmem_limit),
    )(pred4, tgt4, anc4)

    sums = jnp.sum(partials, axis=(0, 1, 3))          # (8,) — finish lane reduce
    s_noobj, c_noobj = sums[0], sums[1]
    s_box, c_obj = sums[2], sums[3]
    s_obj, s_ce = sums[4], sums[5]

    # NOTE: like the PyTorch module, this is NaN if a batch has zero obj cells.
    no_object_loss = s_noobj / c_noobj
    box_loss = s_box / c_obj
    object_loss = s_obj / c_obj
    class_loss = s_ce / c_obj

    lambda_class, lambda_noobj, lambda_obj, lambda_box = 1.0, 10.0, 1.0, 10.0
    return (lambda_box * box_loss + lambda_obj * object_loss
            + lambda_noobj * no_object_loss + lambda_class * class_loss)


# ------------------------ pure-JAX reference (check) ------------------------ #

def _yolo_loss_ref(pred, tgt, anchors):
    def bce(x, y):
        return jnp.maximum(x, 0.0) - x * y + jnp.log1p(jnp.exp(-jnp.abs(x)))

    t0 = tgt[..., 0]
    obj = t0 == 1.0
    noobj = t0 == 0.0
    p = pred.at[..., 1:3].set(jax.nn.sigmoid(pred[..., 1:3]))
    anc = anchors.reshape(1, 3, 1, 1, 2)
    pwh = jnp.exp(p[..., 3:5]) * anc
    pxy = p[..., 1:3]
    txy = tgt[..., 1:3]
    twh = tgt[..., 3:5]

    eps = 1e-7
    b1x1, b1x2 = pxy[..., 0] - pwh[..., 0] / 2, pxy[..., 0] + pwh[..., 0] / 2
    b1y1, b1y2 = pxy[..., 1] - pwh[..., 1] / 2, pxy[..., 1] + pwh[..., 1] / 2
    b2x1, b2x2 = txy[..., 0] - twh[..., 0] / 2, txy[..., 0] + twh[..., 0] / 2
    b2y1, b2y2 = txy[..., 1] - twh[..., 1] / 2, txy[..., 1] + twh[..., 1] / 2
    inter = (jnp.maximum(jnp.minimum(b1x2, b2x2) - jnp.maximum(b1x1, b2x1), 0.0)
             * jnp.maximum(jnp.minimum(b1y2, b2y2) - jnp.maximum(b1y1, b2y1), 0.0))
    union = pwh[..., 0] * pwh[..., 1] + twh[..., 0] * twh[..., 1] - inter + eps
    iou = inter / union
    cw = jnp.maximum(b1x2, b2x2) - jnp.minimum(b1x1, b2x1)
    ch = jnp.maximum(b1y2, b2y2) - jnp.minimum(b1y1, b2y1)
    c2 = cw ** 2 + ch ** 2 + eps
    rho2 = ((b2x1 + b2x2 - b1x1 - b1x2) ** 2 + (b2y1 + b2y2 - b1y1 - b1y2) ** 2) / 4
    v = (4.0 / math.pi ** 2) * (jnp.arctan(twh[..., 0] / (twh[..., 1] + eps))
                                - jnp.arctan(pwh[..., 0] / (pwh[..., 1] + eps))) ** 2
    alpha = v / (v - iou + (1 + eps))
    ciou = iou - (rho2 / c2 + v * alpha)

    n_obj = jnp.sum(obj.astype(jnp.float32))
    n_noobj = jnp.sum(noobj.astype(jnp.float32))
    no_object_loss = jnp.sum(jnp.where(noobj, bce(p[..., 0], t0), 0.0)) / n_noobj
    box_loss = jnp.sum(jnp.where(obj, 1.0 - ciou, 0.0)) / n_obj
    object_loss = jnp.sum(jnp.where(obj, bce(p[..., 0], ciou * t0), 0.0)) / n_obj
    logits = p[..., 5:]
    lse = jax.scipy.special.logsumexp(logits, axis=-1)
    cls = tgt[..., 5].astype(jnp.int32)
    picked = jnp.take_along_axis(logits, cls[..., None], axis=-1)[..., 0]
    class_loss = jnp.sum(jnp.where(obj, lse - picked, 0.0)) / n_obj
    return 10.0 * box_loss + object_loss + 10.0 * no_object_loss + class_loss


# ----------------------------------- main ----------------------------------- #

if __name__ == "__main__":
    key = jax.random.PRNGKey(0)
    N, A, S, NC = 2, 3, 8, 4
    C = 5 + NC
    k1, k2, k3, k4, k5 = jax.random.split(key, 5)

    predictions = jax.random.normal(k1, (N, A, S, S, C), jnp.float32)

    r = jax.random.uniform(k2, (N, A, S, S))
    obj_flag = jnp.where(r < 0.2, 1.0, jnp.where(r < 0.9, 0.0, -1.0))  # 1/0/-1
    xy = jax.random.uniform(k3, (N, A, S, S, 2))
    wh = jax.random.uniform(k4, (N, A, S, S, 2), minval=0.5, maxval=3.0)
    cls = jax.random.randint(k5, (N, A, S, S, 1), 0, NC).astype(jnp.float32)
    target = jnp.concatenate([obj_flag[..., None], xy, wh, cls], axis=-1)

    anchors = jnp.array([[1.0, 1.0], [2.0, 1.5], [0.5, 2.0]], jnp.float32)

    loss = jax.jit(yolo_loss_pallas)(predictions, target, anchors)
    loss = jax.block_until_ready(loss)

    ref = _yolo_loss_ref(predictions, target, anchors)
    assert bool(jnp.isfinite(loss)), "loss is not finite"
    assert abs(float(loss) - float(ref)) < 1e-2 * max(1.0, abs(float(ref))), \
        f"mismatch: kernel={float(loss)} ref={float(ref)}"

    print("KERNEL_OK")
</pallas_src>

<mosaic_0001>
module attributes {stable_mosaic.version = 11 : i64} {
  func.func @kernel(%arg0: i32, %arg1: i32, %arg2: memref<1x9x16x128xf32, #tpu.memory_space<vmem>>, %arg3: memref<1x7x16x128xf32, #tpu.memory_space<vmem>>, %arg4: memref<1x2x1x128xf32, #tpu.memory_space<vmem>>, %arg5: memref<1x1x8x128xf32, #tpu.memory_space<vmem>>) attributes {dimension_semantics = [#tpu.dimension_semantics<parallel>, #tpu.dimension_semantics<parallel>], iteration_bounds = array<i64: 3, 1>, scalar_prefetch = 0 : i64, scratch_operands = 0 : i64, tpu.core_type = #tpu.core_type<tc>, window_params = [{transform_indices = @transform_0, window_bounds = array<i64: 1, 9, 16, 128>}, {transform_indices = @transform_1, window_bounds = array<i64: 1, 7, 16, 128>}, {transform_indices = @transform_2, window_bounds = array<i64: 1, 2, 1, 128>}, {transform_indices = @transform_3, window_bounds = array<i64: 1, 1, 8, 128>}]} {
    %c0 = arith.constant 0 : index
    %c0_0 = arith.constant 0 : index
    %c0_1 = arith.constant 0 : index
    %c0_2 = arith.constant 0 : index
    %0 = vector.load %arg4[%c0, %c0_0, %c0_1, %c0_2] : memref<1x2x1x128xf32, #tpu.memory_space<vmem>>, vector<1x1x1x128xf32>
    %1 = vector.shape_cast %0 : vector<1x1x1x128xf32> to vector<1x128xf32>
    %2 = vector.shape_cast %1 : vector<1x128xf32> to vector<1x128xf32>
    %3 = vector.broadcast %2 : vector<1x128xf32> to vector<8x128xf32>
    %c0_3 = arith.constant 0 : index
    %c1 = arith.constant 1 : index
    %c0_4 = arith.constant 0 : index
    %c0_5 = arith.constant 0 : index
    %4 = vector.load %arg4[%c0_3, %c1, %c0_4, %c0_5] : memref<1x2x1x128xf32, #tpu.memory_space<vmem>>, vector<1x1x1x128xf32>
    %5 = vector.shape_cast %4 : vector<1x1x1x128xf32> to vector<1x128xf32>
    %6 = vector.shape_cast %5 : vector<1x128xf32> to vector<1x128xf32>
    %7 = vector.broadcast %6 : vector<1x128xf32> to vector<8x128xf32>
    %cst = arith.constant 0.000000e+00 : f32
    %8 = vector.broadcast %cst : f32 to vector<8x128xf32>
    %c0_i32 = arith.constant 0 : i32
    %c8_i32 = arith.constant 8 : i32
    %9 = arith.muli %c0_i32, %c8_i32 : i32
    %10 = tpu.assume_multiple %9, 8 : i32
    %c0_6 = arith.constant 0 : index
    %c0_7 = arith.constant 0 : index
    %11 = arith.index_cast %10 : i32 to index
    %c0_8 = arith.constant 0 : index
    %12 = vector.load %arg3[%c0_6, %c0_7, %11, %c0_8] : memref<1x7x16x128xf32, #tpu.memory_space<vmem>>, vector<1x1x8x128xf32>
    %13 = vector.shape_cast %12 : vector<1x1x8x128xf32> to vector<8x128xf32>
    %cst_9 = arith.constant 1.000000e+00 : f32
    %14 = vector.broadcast %cst_9 : f32 to vector<8x128xf32>
    %15 = arith.cmpf oeq, %13, %14 : vector<8x128xf32>
    %cst_10 = arith.constant 0.000000e+00 : f32
    %16 = vector.broadcast %cst_10 : f32 to vector<8x128xf32>
    %17 = arith.cmpf oeq, %13, %16 : vector<8x128xf32>
    %c0_11 = arith.constant 0 : index
    %c0_12 = arith.constant 0 : index
    %18 = arith.index_cast %10 : i32 to index
    %c0_13 = arith.constant 0 : index
    %19 = vector.load %arg2[%c0_11, %c0_12, %18, %c0_13] : memref<1x9x16x128xf32, #tpu.memory_space<vmem>>, vector<1x1x8x128xf32>
    %20 = vector.shape_cast %19 : vector<1x1x8x128xf32> to vector<8x128xf32>
    %cst_14 = arith.constant 0.000000e+00 : f32
    %21 = vector.broadcast %cst_14 : f32 to vector<8x128xf32>
    %22 = arith.maximumf %20, %21 : vector<8x128xf32>
    %23 = math.absf %20 : vector<8x128xf32>
    %cst_15 = arith.constant 0.000000e+00 : f32
    %24 = vector.broadcast %cst_15 : f32 to vector<8x128xf32>
    %25 = arith.subf %24, %23 : vector<8x128xf32>
    %26 = math.exp %25 : vector<8x128xf32>
    %27 = math.log1p %26 : vector<8x128xf32>
    %28 = arith.addf %22, %27 : vector<8x128xf32>
    %cst_16 = arith.constant 0.000000e+00 : f32
    %29 = vector.broadcast %cst_16 : f32 to vector<8x128xf32>
    %30 = arith.select %17, %28, %29 : vector<8x128xi1>, vector<8x128xf32>
    %31 = arith.addf %8, %30 : vector<8x128xf32>
    %cst_17 = arith.constant 1.000000e+00 : f32
    %cst_18 = arith.constant 0.000000e+00 : f32
    %32 = vector.broadcast %cst_17 : f32 to vector<8x128xf32>
    %33 = vector.broadcast %cst_18 : f32 to vector<8x128xf32>
    %34 = arith.select %17, %32, %33 : vector<8x128xi1>, vector<8x128xf32>
    %35 = arith.addf %8, %34 : vector<8x128xf32>
    %c0_19 = arith.constant 0 : index
    %c1_20 = arith.constant 1 : index
    %36 = arith.index_cast %10 : i32 to index
    %c0_21 = arith.constant 0 : index
    %37 = vector.load %arg2[%c0_19, %c1_20, %36, %c0_21] : memref<1x9x16x128xf32, #tpu.memory_space<vmem>>, vector<1x1x8x128xf32>
    %38 = vector.shape_cast %37 : vector<1x1x8x128xf32> to vector<8x128xf32>
    %cst_22 = arith.constant 0.000000e+00 : f32
    %39 = vector.broadcast %cst_22 : f32 to vector<8x128xf32>
    %40 = arith.subf %39, %38 : vector<8x128xf32>
    %41 = math.exp %40 : vector<8x128xf32>
    %cst_23 = arith.constant 1.000000e+00 : f32
    %42 = vector.broadcast %cst_23 : f32 to vector<8x128xf32>
    %43 = arith.addf %42, %41 : vector<8x128xf32>
    %44 = tpu.reciprocal %43 {approx = true} : vector<8x128xf32> -> vector<8x128xf32>
    %c0_24 = arith.constant 0 : index
    %c2 = arith.constant 2 : index
    %45 = arith.index_cast %10 : i32 to index
    %c0_25 = arith.constant 0 : index
    %46 = vector.load %arg2[%c0_24, %c2, %45, %c0_25] : memref<1x9x16x128xf32, #tpu.memory_space<vmem>>, vector<1x1x8x128xf32>
    %47 = vector.shape_cast %46 : vector<1x1x8x128xf32> to vector<8x128xf32>
    %cst_26 = arith.constant 0.000000e+00 : f32
    %48 = vector.broadcast %cst_26 : f32 to vector<8x128xf32>
    %49 = arith.subf %48, %47 : vector<8x128xf32>
    %50 = math.exp %49 : vector<8x128xf32>
    %cst_27 = arith.constant 1.000000e+00 : f32
    %51 = vector.broadcast %cst_27 : f32 to vector<8x128xf32>
    %52 = arith.addf %51, %50 : vector<8x128xf32>
    %53 = tpu.reciprocal %52 {approx = true} : vector<8x128xf32> -> vector<8x128xf32>
    %c0_28 = arith.constant 0 : index
    %c3 = arith.constant 3 : index
    %54 = arith.index_cast %10 : i32 to index
    %c0_29 = arith.constant 0 : index
    %55 = vector.load %arg2[%c0_28, %c3, %54, %c0_29] : memref<1x9x16x128xf32, #tpu.memory_space<vmem>>, vector<1x1x8x128xf32>
    %56 = vector.shape_cast %55 : vector<1x1x8x128xf32> to vector<8x128xf32>
    %57 = math.exp %56 : vector<8x128xf32>
    %58 = arith.mulf %57, %3 : vector<8x128xf32>
    %c0_30 = arith.constant 0 : index
    %c4 = arith.constant 4 : index
    %59 = arith.index_cast %10 : i32 to index
    %c0_31 = arith.constant 0 : index
    %60 = vector.load %arg2[%c0_30, %c4, %59, %c0_31] : memref<1x9x16x128xf32, #tpu.memory_space<vmem>>, vector<1x1x8x128xf32>
    %61 = vector.shape_cast %60 : vector<1x1x8x128xf32> to vector<8x128xf32>
    %62 = math.exp %61 : vector<8x128xf32>
    %63 = arith.mulf %62, %7 : vector<8x128xf32>
    %c0_32 = arith.constant 0 : index
    %c1_33 = arith.constant 1 : index
    %64 = arith.index_cast %10 : i32 to index
    %c0_34 = arith.constant 0 : index
    %65 = vector.load %arg3[%c0_32, %c1_33, %64, %c0_34] : memref<1x7x16x128xf32, #tpu.memory_space<vmem>>, vector<1x1x8x128xf32>
    %66 = vector.shape_cast %65 : vector<1x1x8x128xf32> to vector<8x128xf32>
    %c0_35 = arith.constant 0 : index
    %c2_36 = arith.constant 2 : index
    %67 = arith.index_cast %10 : i32 to index
    %c0_37 = arith.constant 0 : index
    %68 = vector.load %arg3[%c0_35, %c2_36, %67, %c0_37] : memref<1x7x16x128xf32, #tpu.memory_space<vmem>>, vector<1x1x8x128xf32>
    %69 = vector.shape_cast %68 : vector<1x1x8x128xf32> to vector<8x128xf32>
    %c0_38 = arith.constant 0 : index
    %c3_39 = arith.constant 3 : index
    %70 = arith.index_cast %10 : i32 to index
    %c0_40 = arith.constant 0 : index
    %71 = vector.load %arg3[%c0_38, %c3_39, %70, %c0_40] : memref<1x7x16x128xf32, #tpu.memory_space<vmem>>, vector<1x1x8x128xf32>
    %72 = vector.shape_cast %71 : vector<1x1x8x128xf32> to vector<8x128xf32>
    %c0_41 = arith.constant 0 : index
    %c4_42 = arith.constant 4 : index
    %73 = arith.index_cast %10 : i32 to index
    %c0_43 = arith.constant 0 : index
    %74 = vector.load %arg3[%c0_41, %c4_42, %73, %c0_43] : memref<1x7x16x128xf32, #tpu.memory_space<vmem>>, vector<1x1x8x128xf32>
    %75 = vector.shape_cast %74 : vector<1x1x8x128xf32> to vector<8x128xf32>
    %c0_44 = arith.constant 0 : index
    %c6 = arith.constant 6 : index
    %76 = arith.index_cast %10 : i32 to index
    %c0_45 = arith.constant 0 : index
    %77 = vector.load %arg3[%c0_44, %c6, %76, %c0_45] : memref<1x7x16x128xf32, #tpu.memory_space<vmem>>, vector<1x1x8x128xf32>
    %78 = vector.shape_cast %77 : vector<1x1x8x128xf32> to vector<8x128xf32>
    %cst_46 = arith.constant 5.000000e-01 : f32
    %79 = vector.broadcast %cst_46 : f32 to vector<8x128xf32>
    %80 = arith.mulf %58, %79 : vector<8x128xf32>
    %81 = arith.subf %44, %80 : vector<8x128xf32>
    %cst_47 = arith.constant 5.000000e-01 : f32
    %82 = vector.broadcast %cst_47 : f32 to vector<8x128xf32>
    %83 = arith.mulf %58, %82 : vector<8x128xf32>
    %84 = arith.addf %44, %83 : vector<8x128xf32>
    %cst_48 = arith.constant 5.000000e-01 : f32
    %85 = vector.broadcast %cst_48 : f32 to vector<8x128xf32>
    %86 = arith.mulf %63, %85 : vector<8x128xf32>
    %87 = arith.subf %53, %86 : vector<8x128xf32>
    %cst_49 = arith.constant 5.000000e-01 : f32
    %88 = vector.broadcast %cst_49 : f32 to vector<8x128xf32>
    %89 = arith.mulf %63, %88 : vector<8x128xf32>
    %90 = arith.addf %53, %89 : vector<8x128xf32>
    %cst_50 = arith.constant 5.000000e-01 : f32
    %91 = vector.broadcast %cst_50 : f32 to vector<8x128xf32>
    %92 = arith.mulf %72, %91 : vector<8x128xf32>
    %93 = arith.subf %66, %92 : vector<8x128xf32>
    %cst_51 = arith.constant 5.000000e-01 : f32
    %94 = vector.broadcast %cst_51 : f32 to vector<8x128xf32>
    %95 = arith.mulf %72, %94 : vector<8x128xf32>
    %96 = arith.addf %66, %95 : vector<8x128xf32>
    %cst_52 = arith.constant 5.000000e-01 : f32
    %97 = vector.broadcast %cst_52 : f32 to vector<8x128xf32>
    %98 = arith.mulf %75, %97 : vector<8x128xf32>
    %99 = arith.subf %69, %98 : vector<8x128xf32>
    %cst_53 = arith.constant 5.000000e-01 : f32
    %100 = vector.broadcast %cst_53 : f32 to vector<8x128xf32>
    %101 = arith.mulf %75, %100 : vector<8x128xf32>
    %102 = arith.addf %69, %101 : vector<8x128xf32>
    %103 = arith.minimumf %84, %96 : vector<8x128xf32>
    %104 = arith.maximumf %81, %93 : vector<8x128xf32>
    %105 = arith.subf %103, %104 : vector<8x128xf32>
    %cst_54 = arith.constant 0.000000e+00 : f32
    %106 = vector.broadcast %cst_54 : f32 to vector<8x128xf32>
    %107 = arith.maximumf %105, %106 : vector<8x128xf32>
    %108 = arith.minimumf %90, %102 : vector<8x128xf32>
    %109 = arith.maximumf %87, %99 : vector<8x128xf32>
    %110 = arith.subf %108, %109 : vector<8x128xf32>
    %cst_55 = arith.constant 0.000000e+00 : f32
    %111 = vector.broadcast %cst_55 : f32 to vector<8x128xf32>
    %112 = arith.maximumf %110, %111 : vector<8x128xf32>
    %113 = arith.mulf %107, %112 : vector<8x128xf32>
    %114 = arith.mulf %58, %63 : vector<8x128xf32>
    %115 = arith.mulf %72, %75 : vector<8x128xf32>
    %116 = arith.addf %114, %115 : vector<8x128xf32>
    %117 = arith.subf %116, %113 : vector<8x128xf32>
    %cst_56 = arith.constant 1.000000e-07 : f32
    %118 = vector.broadcast %cst_56 : f32 to vector<8x128xf32>
    %119 = arith.addf %117, %118 : vector<8x128xf32>
    %120 = arith.divf %113, %119 : vector<8x128xf32>
    %121 = arith.maximumf %84, %96 : vector<8x128xf32>
    %122 = arith.minimumf %81, %93 : vector<8x128xf32>
    %123 = arith.subf %121, %122 : vector<8x128xf32>
    %124 = arith.maximumf %90, %102 : vector<8x128xf32>
    %125 = arith.minimumf %87, %99 : vector<8x128xf32>
    %126 = arith.subf %124, %125 : vector<8x128xf32>
    %127 = arith.mulf %123, %123 : vector<8x128xf32>
    %128 = arith.mulf %126, %126 : vector<8x128xf32>
    %129 = arith.addf %127, %128 : vector<8x128xf32>
    %cst_57 = arith.constant 1.000000e-07 : f32
    %130 = vector.broadcast %cst_57 : f32 to vector<8x128xf32>
    %131 = arith.addf %129, %130 : vector<8x128xf32>
    %132 = arith.addf %93, %96 : vector<8x128xf32>
    %133 = arith.subf %132, %81 : vector<8x128xf32>
    %134 = arith.subf %133, %84 : vector<8x128xf32>
    %135 = arith.mulf %134, %134 : vector<8x128xf32>
    %136 = arith.addf %99, %102 : vector<8x128xf32>
    %137 = arith.subf %136, %87 : vector<8x128xf32>
    %138 = arith.subf %137, %90 : vector<8x128xf32>
    %139 = arith.mulf %138, %138 : vector<8x128xf32>
    %140 = arith.addf %135, %139 : vector<8x128xf32>
    %cst_58 = arith.constant 2.500000e-01 : f32
    %141 = vector.broadcast %cst_58 : f32 to vector<8x128xf32>
    %142 = arith.mulf %140, %141 : vector<8x128xf32>
    %cst_59 = arith.constant 1.000000e-07 : f32
    %143 = vector.broadcast %cst_59 : f32 to vector<8x128xf32>
    %144 = arith.addf %63, %143 : vector<8x128xf32>
    %145 = arith.divf %58, %144 : vector<8x128xf32>
    %cst_60 = arith.constant 0.000000e+00 : f32
    %146 = vector.broadcast %cst_60 : f32 to vector<8x128xf32>
    %147 = arith.cmpf olt, %145, %146 : vector<8x128xf32>
    %cst_61 = arith.constant -1.000000e+00 : f32
    %cst_62 = arith.constant 1.000000e+00 : f32
    %148 = vector.broadcast %cst_61 : f32 to vector<8x128xf32>
    %149 = vector.broadcast %cst_62 : f32 to vector<8x128xf32>
    %150 = arith.select %147, %148, %149 : vector<8x128xi1>, vector<8x128xf32>
    %151 = math.absf %145 : vector<8x128xf32>
    %cst_63 = arith.constant 2.41421366 : f32
    %152 = vector.broadcast %cst_63 : f32 to vector<8x128xf32>
    %153 = arith.cmpf ogt, %151, %152 : vector<8x128xf32>
    %cst_64 = arith.constant 0.414213568 : f32
    %154 = vector.broadcast %cst_64 : f32 to vector<8x128xf32>
    %155 = arith.cmpf ogt, %151, %154 : vector<8x128xf32>
    %cst_65 = arith.constant 0.785398185 : f32
    %cst_66 = arith.constant 0.000000e+00 : f32
    %156 = vector.broadcast %cst_65 : f32 to vector<8x128xf32>
    %157 = vector.broadcast %cst_66 : f32 to vector<8x128xf32>
    %158 = arith.select %155, %156, %157 : vector<8x128xi1>, vector<8x128xf32>
    %cst_67 = arith.constant 1.57079637 : f32
    %159 = vector.broadcast %cst_67 : f32 to vector<8x128xf32>
    %160 = arith.select %153, %159, %158 : vector<8x128xi1>, vector<8x128xf32>
    %cst_68 = arith.constant 1.000000e-30 : f32
    %161 = vector.broadcast %cst_68 : f32 to vector<8x128xf32>
    %162 = arith.maximumf %151, %161 : vector<8x128xf32>
    %cst_69 = arith.constant -1.000000e+00 : f32
    %163 = vector.broadcast %cst_69 : f32 to vector<8x128xf32>
    %164 = arith.divf %163, %162 : vector<8x128xf32>
    %cst_70 = arith.constant 1.000000e+00 : f32
    %165 = vector.broadcast %cst_70 : f32 to vector<8x128xf32>
    %166 = arith.subf %151, %165 : vector<8x128xf32>
    %cst_71 = arith.constant 1.000000e+00 : f32
    %167 = vector.broadcast %cst_71 : f32 to vector<8x128xf32>
    %168 = arith.addf %151, %167 : vector<8x128xf32>
    %169 = arith.divf %166, %168 : vector<8x128xf32>
    %170 = arith.select %155, %169, %151 : vector<8x128xi1>, vector<8x128xf32>
    %171 = arith.select %153, %164, %170 : vector<8x128xi1>, vector<8x128xf32>
    %172 = arith.mulf %171, %171 : vector<8x128xf32>
    %cst_72 = arith.constant 0.0805374458 : f32
    %173 = vector.broadcast %cst_72 : f32 to vector<8x128xf32>
    %174 = arith.mulf %173, %172 : vector<8x128xf32>
    %cst_73 = arith.constant 0.138776854 : f32
    %175 = vector.broadcast %cst_73 : f32 to vector<8x128xf32>
    %176 = arith.subf %174, %175 : vector<8x128xf32>
    %177 = arith.mulf %176, %172 : vector<8x128xf32>
    %cst_74 = arith.constant 0.199777111 : f32
    %178 = vector.broadcast %cst_74 : f32 to vector<8x128xf32>
    %179 = arith.addf %177, %178 : vector<8x128xf32>
    %180 = arith.mulf %179, %172 : vector<8x128xf32>
    %cst_75 = arith.constant 0.333329499 : f32
    %181 = vector.broadcast %cst_75 : f32 to vector<8x128xf32>
    %182 = arith.subf %180, %181 : vector<8x128xf32>
    %183 = arith.mulf %182, %172 : vector<8x128xf32>
    %184 = arith.mulf %183, %171 : vector<8x128xf32>
    %185 = arith.addf %184, %171 : vector<8x128xf32>
    %186 = arith.addf %160, %185 : vector<8x128xf32>
    %187 = arith.mulf %150, %186 : vector<8x128xf32>
    %188 = arith.subf %78, %187 : vector<8x128xf32>
    %189 = arith.mulf %188, %188 : vector<8x128xf32>
    %cst_76 = arith.constant 0.405284733 : f32
    %190 = vector.broadcast %cst_76 : f32 to vector<8x128xf32>
    %191 = arith.mulf %190, %189 : vector<8x128xf32>
    %192 = arith.subf %191, %120 : vector<8x128xf32>
    %cst_77 = arith.constant 1.00000012 : f32
    %193 = vector.broadcast %cst_77 : f32 to vector<8x128xf32>
    %194 = arith.addf %192, %193 : vector<8x128xf32>
    %195 = arith.divf %191, %194 : vector<8x128xf32>
    %196 = arith.divf %142, %131 : vector<8x128xf32>
    %197 = arith.mulf %191, %195 : vector<8x128xf32>
    %198 = arith.addf %196, %197 : vector<8x128xf32>
    %199 = arith.subf %120, %198 : vector<8x128xf32>
    %cst_78 = arith.constant 1.000000e+00 : f32
    %200 = vector.broadcast %cst_78 : f32 to vector<8x128xf32>
    %201 = arith.subf %200, %199 : vector<8x128xf32>
    %cst_79 = arith.constant 0.000000e+00 : f32
    %202 = vector.broadcast %cst_79 : f32 to vector<8x128xf32>
    %203 = arith.select %15, %201, %202 : vector<8x128xi1>, vector<8x128xf32>
    %204 = arith.addf %8, %203 : vector<8x128xf32>
    %cst_80 = arith.constant 1.000000e+00 : f32
    %cst_81 = arith.constant 0.000000e+00 : f32
    %205 = vector.broadcast %cst_80 : f32 to vector<8x128xf32>
    %206 = vector.broadcast %cst_81 : f32 to vector<8x128xf32>
    %207 = arith.select %15, %205, %206 : vector<8x128xi1>, vector<8x128xf32>
    %208 = arith.addf %8, %207 : vector<8x128xf32>
    %209 = arith.mulf %20, %199 : vector<8x128xf32>
    %210 = arith.subf %28, %209 : vector<8x128xf32>
    %cst_82 = arith.constant 0.000000e+00 : f32
    %211 = vector.broadcast %cst_82 : f32 to vector<8x128xf32>
    %212 = arith.select %15, %210, %211 : vector<8x128xi1>, vector<8x128xf32>
    %213 = arith.addf %8, %212 : vector<8x128xf32>
    %c0_83 = arith.constant 0 : index
    %c5 = arith.constant 5 : index
    %214 = arith.index_cast %10 : i32 to index
    %c0_84 = arith.constant 0 : index
    %215 = vector.load %arg3[%c0_83, %c5, %214, %c0_84] : memref<1x7x16x128xf32, #tpu.memory_space<vmem>>, vector<1x1x8x128xf32>
    %216 = vector.shape_cast %215 : vector<1x1x8x128xf32> to vector<8x128xf32>
    %c0_85 = arith.constant 0 : index
    %c5_86 = arith.constant 5 : index
    %217 = arith.index_cast %10 : i32 to index
    %c0_87 = arith.constant 0 : index
    %218 = vector.load %arg2[%c0_85, %c5_86, %217, %c0_87] : memref<1x9x16x128xf32, #tpu.memory_space<vmem>>, vector<1x1x8x128xf32>
    %219 = vector.shape_cast %218 : vector<1x1x8x128xf32> to vector<8x128xf32>
    %c0_88 = arith.constant 0 : index
    %c6_89 = arith.constant 6 : index
    %220 = arith.index_cast %10 : i32 to index
    %c0_90 = arith.constant 0 : index
    %221 = vector.load %arg2[%c0_88, %c6_89, %220, %c0_90] : memref<1x9x16x128xf32, #tpu.memory_space<vmem>>, vector<1x1x8x128xf32>
    %222 = vector.shape_cast %221 : vector<1x1x8x128xf32> to vector<8x128xf32>
    %c0_91 = arith.constant 0 : index
    %c7 = arith.constant 7 : index
    %223 = arith.index_cast %10 : i32 to index
    %c0_92 = arith.constant 0 : index
    %224 = vector.load %arg2[%c0_91, %c7, %223, %c0_92] : memref<1x9x16x128xf32, #tpu.memory_space<vmem>>, vector<1x1x8x128xf32>
    %225 = vector.shape_cast %224 : vector<1x1x8x128xf32> to vector<8x128xf32>
    %c0_93 = arith.constant 0 : index
    %c8 = arith.constant 8 : index
    %226 = arith.index_cast %10 : i32 to index
    %c0_94 = arith.constant 0 : index
    %227 = vector.load %arg2[%c0_93, %c8, %226, %c0_94] : memref<1x9x16x128xf32, #tpu.memory_space<vmem>>, vector<1x1x8x128xf32>
    %228 = vector.shape_cast %227 : vector<1x1x8x128xf32> to vector<8x128xf32>
    %229 = arith.maximumf %219, %222 : vector<8x128xf32>
    %230 = arith.maximumf %229, %225 : vector<8x128xf32>
    %231 = arith.maximumf %230, %228 : vector<8x128xf32>
    %cst_95 = arith.constant 0.000000e+00 : f32
    %232 = vector.broadcast %cst_95 : f32 to vector<8x128xf32>
    %cst_96 = arith.constant 0.000000e+00 : f32
    %233 = vector.broadcast %cst_96 : f32 to vector<8x128xf32>
    %234 = arith.subf %219, %231 : vector<8x128xf32>
    %235 = math.exp %234 : vector<8x128xf32>
    %236 = arith.addf %232, %235 : vector<8x128xf32>
    %cst_97 = arith.constant 0.000000e+00 : f32
    %237 = vector.broadcast %cst_97 : f32 to vector<8x128xf32>
    %238 = arith.cmpf oeq, %216, %237 : vector<8x128xf32>
    %cst_98 = arith.constant 0.000000e+00 : f32
    %239 = vector.broadcast %cst_98 : f32 to vector<8x128xf32>
    %240 = arith.select %238, %219, %239 : vector<8x128xi1>, vector<8x128xf32>
    %241 = arith.addf %233, %240 : vector<8x128xf32>
    %242 = arith.subf %222, %231 : vector<8x128xf32>
    %243 = math.exp %242 : vector<8x128xf32>
    %244 = arith.addf %236, %243 : vector<8x128xf32>
    %cst_99 = arith.constant 1.000000e+00 : f32
    %245 = vector.broadcast %cst_99 : f32 to vector<8x128xf32>
    %246 = arith.cmpf oeq, %216, %245 : vector<8x128xf32>
    %cst_100 = arith.constant 0.000000e+00 : f32
    %247 = vector.broadcast %cst_100 : f32 to vector<8x128xf32>
    %248 = arith.select %246, %222, %247 : vector<8x128xi1>, vector<8x128xf32>
    %249 = arith.addf %241, %248 : vector<8x128xf32>
    %250 = arith.subf %225, %231 : vector<8x128xf32>
    %251 = math.exp %250 : vector<8x128xf32>
    %252 = arith.addf %244, %251 : vector<8x128xf32>
    %cst_101 = arith.constant 2.000000e+00 : f32
    %253 = vector.broadcast %cst_101 : f32 to vector<8x128xf32>
    %254 = arith.cmpf oeq, %216, %253 : vector<8x128xf32>
    %cst_102 = arith.constant 0.000000e+00 : f32
    %255 = vector.broadcast %cst_102 : f32 to vector<8x128xf32>
    %256 = arith.select %254, %225, %255 : vector<8x128xi1>, vector<8x128xf32>
    %257 = arith.addf %249, %256 : vector<8x128xf32>
    %258 = arith.subf %228, %231 : vector<8x128xf32>
    %259 = math.exp %258 : vector<8x128xf32>
    %260 = arith.addf %252, %259 : vector<8x128xf32>
    %cst_103 = arith.constant 3.000000e+00 : f32
    %261 = vector.broadcast %cst_103 : f32 to vector<8x128xf32>
    %262 = arith.cmpf oeq, %216, %261 : vector<8x128xf32>
    %cst_104 = arith.constant 0.000000e+00 : f32
    %263 = vector.broadcast %cst_104 : f32 to vector<8x128xf32>
    %264 = arith.select %262, %228, %263 : vector<8x128xi1>, vector<8x128xf32>
    %265 = arith.addf %257, %264 : vector<8x128xf32>
    %266 = math.log %260 : vector<8x128xf32>
    %267 = arith.addf %231, %266 : vector<8x128xf32>
    %268 = arith.subf %267, %265 : vector<8x128xf32>
    %cst_105 = arith.constant 0.000000e+00 : f32
    %269 = vector.broadcast %cst_105 : f32 to vector<8x128xf32>
    %270 = arith.select %15, %268, %269 : vector<8x128xi1>, vector<8x128xf32>
    %271 = arith.addf %8, %270 : vector<8x128xf32>
    %c1_i32 = arith.constant 1 : i32
    %c8_i32_106 = arith.constant 8 : i32
    %272 = arith.muli %c1_i32, %c8_i32_106 : i32
    %273 = tpu.assume_multiple %272, 8 : i32
    %c0_107 = arith.constant 0 : index
    %c0_108 = arith.constant 0 : index
    %274 = arith.index_cast %273 : i32 to index
    %c0_109 = arith.constant 0 : index
    %275 = vector.load %arg3[%c0_107, %c0_108, %274, %c0_109] : memref<1x7x16x128xf32, #tpu.memory_space<vmem>>, vector<1x1x8x128xf32>
    %276 = vector.shape_cast %275 : vector<1x1x8x128xf32> to vector<8x128xf32>
    %cst_110 = arith.constant 1.000000e+00 : f32
    %277 = vector.broadcast %cst_110 : f32 to vector<8x128xf32>
    %278 = arith.cmpf oeq, %276, %277 : vector<8x128xf32>
    %cst_111 = arith.constant 0.000000e+00 : f32
    %279 = vector.broadcast %cst_111 : f32 to vector<8x128xf32>
    %280 = arith.cmpf oeq, %276, %279 : vector<8x128xf32>
    %c0_112 = arith.constant 0 : index
    %c0_113 = arith.constant 0 : index
    %281 = arith.index_cast %273 : i32 to index
    %c0_114 = arith.constant 0 : index
    %282 = vector.load %arg2[%c0_112, %c0_113, %281, %c0_114] : memref<1x9x16x128xf32, #tpu.memory_space<vmem>>, vector<1x1x8x128xf32>
    %283 = vector.shape_cast %282 : vector<1x1x8x128xf32> to vector<8x128xf32>
    %cst_115 = arith.constant 0.000000e+00 : f32
    %284 = vector.broadcast %cst_115 : f32 to vector<8x128xf32>
    %285 = arith.maximumf %283, %284 : vector<8x128xf32>
    %286 = math.absf %283 : vector<8x128xf32>
    %cst_116 = arith.constant 0.000000e+00 : f32
    %287 = vector.broadcast %cst_116 : f32 to vector<8x128xf32>
    %288 = arith.subf %287, %286 : vector<8x128xf32>
    %289 = math.exp %288 : vector<8x128xf32>
    %290 = math.log1p %289 : vector<8x128xf32>
    %291 = arith.addf %285, %290 : vector<8x128xf32>
    %cst_117 = arith.constant 0.000000e+00 : f32
    %292 = vector.broadcast %cst_117 : f32 to vector<8x128xf32>
    %293 = arith.select %280, %291, %292 : vector<8x128xi1>, vector<8x128xf32>
    %294 = arith.addf %31, %293 : vector<8x128xf32>
    %cst_118 = arith.constant 1.000000e+00 : f32
    %cst_119 = arith.constant 0.000000e+00 : f32
    %295 = vector.broadcast %cst_118 : f32 to vector<8x128xf32>
    %296 = vector.broadcast %cst_119 : f32 to vector<8x128xf32>
    %297 = arith.select %280, %295, %296 : vector<8x128xi1>, vector<8x128xf32>
    %298 = arith.addf %35, %297 : vector<8x128xf32>
    %c0_120 = arith.constant 0 : index
    %c1_121 = arith.constant 1 : index
    %299 = arith.index_cast %273 : i32 to index
    %c0_122 = arith.constant 0 : index
    %300 = vector.load %arg2[%c0_120, %c1_121, %299, %c0_122] : memref<1x9x16x128xf32, #tpu.memory_space<vmem>>, vector<1x1x8x128xf32>
    %301 = vector.shape_cast %300 : vector<1x1x8x128xf32> to vector<8x128xf32>
    %cst_123 = arith.constant 0.000000e+00 : f32
    %302 = vector.broadcast %cst_123 : f32 to vector<8x128xf32>
    %303 = arith.subf %302, %301 : vector<8x128xf32>
    %304 = math.exp %303 : vector<8x128xf32>
    %cst_124 = arith.constant 1.000000e+00 : f32
    %305 = vector.broadcast %cst_124 : f32 to vector<8x128xf32>
    %306 = arith.addf %305, %304 : vector<8x128xf32>
    %307 = tpu.reciprocal %306 {approx = true} : vector<8x128xf32> -> vector<8x128xf32>
    %c0_125 = arith.constant 0 : index
    %c2_126 = arith.constant 2 : index
    %308 = arith.index_cast %273 : i32 to index
    %c0_127 = arith.constant 0 : index
    %309 = vector.load %arg2[%c0_125, %c2_126, %308, %c0_127] : memref<1x9x16x128xf32, #tpu.memory_space<vmem>>, vector<1x1x8x128xf32>
    %310 = vector.shape_cast %309 : vector<1x1x8x128xf32> to vector<8x128xf32>
    %cst_128 = arith.constant 0.000000e+00 : f32
    %311 = vector.broadcast %cst_128 : f32 to vector<8x128xf32>
    %312 = arith.subf %311, %310 : vector<8x128xf32>
    %313 = math.exp %312 : vector<8x128xf32>
    %cst_129 = arith.constant 1.000000e+00 : f32
    %314 = vector.broadcast %cst_129 : f32 to vector<8x128xf32>
    %315 = arith.addf %314, %313 : vector<8x128xf32>
    %316 = tpu.reciprocal %315 {approx = true} : vector<8x128xf32> -> vector<8x128xf32>
    %c0_130 = arith.constant 0 : index
    %c3_131 = arith.constant 3 : index
    %317 = arith.index_cast %273 : i32 to index
    %c0_132 = arith.constant 0 : index
    %318 = vector.load %arg2[%c0_130, %c3_131, %317, %c0_132] : memref<1x9x16x128xf32, #tpu.memory_space<vmem>>, vector<1x1x8x128xf32>
    %319 = vector.shape_cast %318 : vector<1x1x8x128xf32> to vector<8x128xf32>
    %320 = math.exp %319 : vector<8x128xf32>
    %321 = arith.mulf %320, %3 : vector<8x128xf32>
    %c0_133 = arith.constant 0 : index
    %c4_134 = arith.constant 4 : index
    %322 = arith.index_cast %273 : i32 to index
    %c0_135 = arith.constant 0 : index
    %323 = vector.load %arg2[%c0_133, %c4_134, %322, %c0_135] : memref<1x9x16x128xf32, #tpu.memory_space<vmem>>, vector<1x1x8x128xf32>
    %324 = vector.shape_cast %323 : vector<1x1x8x128xf32> to vector<8x128xf32>
    %325 = math.exp %324 : vector<8x128xf32>
    %326 = arith.mulf %325, %7 : vector<8x128xf32>
    %c0_136 = arith.constant 0 : index
    %c1_137 = arith.constant 1 : index
    %327 = arith.index_cast %273 : i32 to index
    %c0_138 = arith.constant 0 : index
    %328 = vector.load %arg3[%c0_136, %c1_137, %327, %c0_138] : memref<1x7x16x128xf32, #tpu.memory_space<vmem>>, vector<1x1x8x128xf32>
    %329 = vector.shape_cast %328 : vector<1x1x8x128xf32> to vector<8x128xf32>
    %c0_139 = arith.constant 0 : index
    %c2_140 = arith.constant 2 : index
    %330 = arith.index_cast %273 : i32 to index
    %c0_141 = arith.constant 0 : index
    %331 = vector.load %arg3[%c0_139, %c2_140, %330, %c0_141] : memref<1x7x16x128xf32, #tpu.memory_space<vmem>>, vector<1x1x8x128xf32>
    %332 = vector.shape_cast %331 : vector<1x1x8x128xf32> to vector<8x128xf32>
    %c0_142 = arith.constant 0 : index
    %c3_143 = arith.constant 3 : index
    %333 = arith.index_cast %273 : i32 to index
    %c0_144 = arith.constant 0 : index
    %334 = vector.load %arg3[%c0_142, %c3_143, %333, %c0_144] : memref<1x7x16x128xf32, #tpu.memory_space<vmem>>, vector<1x1x8x128xf32>
    %335 = vector.shape_cast %334 : vector<1x1x8x128xf32> to vector<8x128xf32>
    %c0_145 = arith.constant 0 : index
    %c4_146 = arith.constant 4 : index
    %336 = arith.index_cast %273 : i32 to index
    %c0_147 = arith.constant 0 : index
    %337 = vector.load %arg3[%c0_145, %c4_146, %336, %c0_147] : memref<1x7x16x128xf32, #tpu.memory_space<vmem>>, vector<1x1x8x128xf32>
    %338 = vector.shape_cast %337 : vector<1x1x8x128xf32> to vector<8x128xf32>
    %c0_148 = arith.constant 0 : index
    %c6_149 = arith.constant 6 : index
    %339 = arith.index_cast %273 : i32 to index
    %c0_150 = arith.constant 0 : index
    %340 = vector.load %arg3[%c0_148, %c6_149, %339, %c0_150] : memref<1x7x16x128xf32, #tpu.memory_space<vmem>>, vector<1x1x8x128xf32>
    %341 = vector.shape_cast %340 : vector<1x1x8x128xf32> to vector<8x128xf32>
    %cst_151 = arith.constant 5.000000e-01 : f32
    %342 = vector.broadcast %cst_151 : f32 to vector<8x128xf32>
    %343 = arith.mulf %321, %342 : vector<8x128xf32>
    %344 = arith.subf %307, %343 : vector<8x128xf32>
    %cst_152 = arith.constant 5.000000e-01 : f32
    %345 = vector.broadcast %cst_152 : f32 to vector<8x128xf32>
    %346 = arith.mulf %321, %345 : vector<8x128xf32>
    %347 = arith.addf %307, %346 : vector<8x128xf32>
    %cst_153 = arith.constant 5.000000e-01 : f32
    %348 = vector.broadcast %cst_153 : f32 to vector<8x128xf32>
    %349 = arith.mulf %326, %348 : vector<8x128xf32>
    %350 = arith.subf %316, %349 : vector<8x128xf32>
    %cst_154 = arith.constant 5.000000e-01 : f32
    %351 = vector.broadcast %cst_154 : f32 to vector<8x128xf32>
    %352 = arith.mulf %326, %351 : vector<8x128xf32>
    %353 = arith.addf %316, %352 : vector<8x128xf32>
    %cst_155 = arith.constant 5.000000e-01 : f32
    %354 = vector.broadcast %cst_155 : f32 to vector<8x128xf32>
    %355 = arith.mulf %335, %354 : vector<8x128xf32>
    %356 = arith.subf %329, %355 : vector<8x128xf32>
    %cst_156 = arith.constant 5.000000e-01 : f32
    %357 = vector.broadcast %cst_156 : f32 to vector<8x128xf32>
    %358 = arith.mulf %335, %357 : vector<8x128xf32>
    %359 = arith.addf %329, %358 : vector<8x128xf32>
    %cst_157 = arith.constant 5.000000e-01 : f32
    %360 = vector.broadcast %cst_157 : f32 to vector<8x128xf32>
    %361 = arith.mulf %338, %360 : vector<8x128xf32>
    %362 = arith.subf %332, %361 : vector<8x128xf32>
    %cst_158 = arith.constant 5.000000e-01 : f32
    %363 = vector.broadcast %cst_158 : f32 to vector<8x128xf32>
    %364 = arith.mulf %338, %363 : vector<8x128xf32>
    %365 = arith.addf %332, %364 : vector<8x128xf32>
    %366 = arith.minimumf %347, %359 : vector<8x128xf32>
    %367 = arith.maximumf %344, %356 : vector<8x128xf32>
    %368 = arith.subf %366, %367 : vector<8x128xf32>
    %cst_159 = arith.constant 0.000000e+00 : f32
    %369 = vector.broadcast %cst_159 : f32 to vector<8x128xf32>
    %370 = arith.maximumf %368, %369 : vector<8x128xf32>
    %371 = arith.minimumf %353, %365 : vector<8x128xf32>
    %372 = arith.maximumf %350, %362 : vector<8x128xf32>
    %373 = arith.subf %371, %372 : vector<8x128xf32>
    %cst_160 = arith.constant 0.000000e+00 : f32
    %374 = vector.broadcast %cst_160 : f32 to vector<8x128xf32>
    %375 = arith.maximumf %373, %374 : vector<8x128xf32>
    %376 = arith.mulf %370, %375 : vector<8x128xf32>
    %377 = arith.mulf %321, %326 : vector<8x128xf32>
    %378 = arith.mulf %335, %338 : vector<8x128xf32>
    %379 = arith.addf %377, %378 : vector<8x128xf32>
    %380 = arith.subf %379, %376 : vector<8x128xf32>
    %cst_161 = arith.constant 1.000000e-07 : f32
    %381 = vector.broadcast %cst_161 : f32 to vector<8x128xf32>
    %382 = arith.addf %380, %381 : vector<8x128xf32>
    %383 = arith.divf %376, %382 : vector<8x128xf32>
    %384 = arith.maximumf %347, %359 : vector<8x128xf32>
    %385 = arith.minimumf %344, %356 : vector<8x128xf32>
    %386 = arith.subf %384, %385 : vector<8x128xf32>
    %387 = arith.maximumf %353, %365 : vector<8x128xf32>
    %388 = arith.minimumf %350, %362 : vector<8x128xf32>
    %389 = arith.subf %387, %388 : vector<8x128xf32>
    %390 = arith.mulf %386, %386 : vector<8x128xf32>
    %391 = arith.mulf %389, %389 : vector<8x128xf32>
    %392 = arith.addf %390, %391 : vector<8x128xf32>
    %cst_162 = arith.constant 1.000000e-07 : f32
    %393 = vector.broadcast %cst_162 : f32 to vector<8x128xf32>
    %394 = arith.addf %392, %393 : vector<8x128xf32>
    %395 = arith.addf %356, %359 : vector<8x128xf32>
    %396 = arith.subf %395, %344 : vector<8x128xf32>
    %397 = arith.subf %396, %347 : vector<8x128xf32>
    %398 = arith.mulf %397, %397 : vector<8x128xf32>
    %399 = arith.addf %362, %365 : vector<8x128xf32>
    %400 = arith.subf %399, %350 : vector<8x128xf32>
    %401 = arith.subf %400, %353 : vector<8x128xf32>
    %402 = arith.mulf %401, %401 : vector<8x128xf32>
    %403 = arith.addf %398, %402 : vector<8x128xf32>
    %cst_163 = arith.constant 2.500000e-01 : f32
    %404 = vector.broadcast %cst_163 : f32 to vector<8x128xf32>
    %405 = arith.mulf %403, %404 : vector<8x128xf32>
    %cst_164 = arith.constant 1.000000e-07 : f32
    %406 = vector.broadcast %cst_164 : f32 to vector<8x128xf32>
    %407 = arith.addf %326, %406 : vector<8x128xf32>
    %408 = arith.divf %321, %407 : vector<8x128xf32>
    %cst_165 = arith.constant 0.000000e+00 : f32
    %409 = vector.broadcast %cst_165 : f32 to vector<8x128xf32>
    %410 = arith.cmpf olt, %408, %409 : vector<8x128xf32>
    %cst_166 = arith.constant -1.000000e+00 : f32
    %cst_167 = arith.constant 1.000000e+00 : f32
    %411 = vector.broadcast %cst_166 : f32 to vector<8x128xf32>
    %412 = vector.broadcast %cst_167 : f32 to vector<8x128xf32>
    %413 = arith.select %410, %411, %412 : vector<8x128xi1>, vector<8x128xf32>
    %414 = math.absf %408 : vector<8x128xf32>
    %cst_168 = arith.constant 2.41421366 : f32
    %415 = vector.broadcast %cst_168 : f32 to vector<8x128xf32>
    %416 = arith.cmpf ogt, %414, %415 : vector<8x128xf32>
    %cst_169 = arith.constant 0.414213568 : f32
    %417 = vector.broadcast %cst_169 : f32 to vector<8x128xf32>
    %418 = arith.cmpf ogt, %414, %417 : vector<8x128xf32>
    %cst_170 = arith.constant 0.785398185 : f32
    %cst_171 = arith.constant 0.000000e+00 : f32
    %419 = vector.broadcast %cst_170 : f32 to vector<8x128xf32>
    %420 = vector.broadcast %cst_171 : f32 to vector<8x128xf32>
    %421 = arith.select %418, %419, %420 : vector<8x128xi1>, vector<8x128xf32>
    %cst_172 = arith.constant 1.57079637 : f32
    %422 = vector.broadcast %cst_172 : f32 to vector<8x128xf32>
    %423 = arith.select %416, %422, %421 : vector<8x128xi1>, vector<8x128xf32>
    %cst_173 = arith.constant 1.000000e-30 : f32
    %424 = vector.broadcast %cst_173 : f32 to vector<8x128xf32>
    %425 = arith.maximumf %414, %424 : vector<8x128xf32>
    %cst_174 = arith.constant -1.000000e+00 : f32
    %426 = vector.broadcast %cst_174 : f32 to vector<8x128xf32>
    %427 = arith.divf %426, %425 : vector<8x128xf32>
    %cst_175 = arith.constant 1.000000e+00 : f32
    %428 = vector.broadcast %cst_175 : f32 to vector<8x128xf32>
    %429 = arith.subf %414, %428 : vector<8x128xf32>
    %cst_176 = arith.constant 1.000000e+00 : f32
    %430 = vector.broadcast %cst_176 : f32 to vector<8x128xf32>
    %431 = arith.addf %414, %430 : vector<8x128xf32>
    %432 = arith.divf %429, %431 : vector<8x128xf32>
    %433 = arith.select %418, %432, %414 : vector<8x128xi1>, vector<8x128xf32>
    %434 = arith.select %416, %427, %433 : vector<8x128xi1>, vector<8x128xf32>
    %435 = arith.mulf %434, %434 : vector<8x128xf32>
    %cst_177 = arith.constant 0.0805374458 : f32
    %436 = vector.broadcast %cst_177 : f32 to vector<8x128xf32>
    %437 = arith.mulf %436, %435 : vector<8x128xf32>
    %cst_178 = arith.constant 0.138776854 : f32
    %438 = vector.broadcast %cst_178 : f32 to vector<8x128xf32>
    %439 = arith.subf %437, %438 : vector<8x128xf32>
    %440 = arith.mulf %439, %435 : vector<8x128xf32>
    %cst_179 = arith.constant 0.199777111 : f32
    %441 = vector.broadcast %cst_179 : f32 to vector<8x128xf32>
    %442 = arith.addf %440, %441 : vector<8x128xf32>
    %443 = arith.mulf %442, %435 : vector<8x128xf32>
    %cst_180 = arith.constant 0.333329499 : f32
    %444 = vector.broadcast %cst_180 : f32 to vector<8x128xf32>
    %445 = arith.subf %443, %444 : vector<8x128xf32>
    %446 = arith.mulf %445, %435 : vector<8x128xf32>
    %447 = arith.mulf %446, %434 : vector<8x128xf32>
    %448 = arith.addf %447, %434 : vector<8x128xf32>
    %449 = arith.addf %423, %448 : vector<8x128xf32>
    %450 = arith.mulf %413, %449 : vector<8x128xf32>
    %451 = arith.subf %341, %450 : vector<8x128xf32>
    %452 = arith.mulf %451, %451 : vector<8x128xf32>
    %cst_181 = arith.constant 0.405284733 : f32
    %453 = vector.broadcast %cst_181 : f32 to vector<8x128xf32>
    %454 = arith.mulf %453, %452 : vector<8x128xf32>
    %455 = arith.subf %454, %383 : vector<8x128xf32>
    %cst_182 = arith.constant 1.00000012 : f32
    %456 = vector.broadcast %cst_182 : f32 to vector<8x128xf32>
    %457 = arith.addf %455, %456 : vector<8x128xf32>
    %458 = arith.divf %454, %457 : vector<8x128xf32>
    %459 = arith.divf %405, %394 : vector<8x128xf32>
    %460 = arith.mulf %454, %458 : vector<8x128xf32>
    %461 = arith.addf %459, %460 : vector<8x128xf32>
    %462 = arith.subf %383, %461 : vector<8x128xf32>
    %cst_183 = arith.constant 1.000000e+00 : f32
    %463 = vector.broadcast %cst_183 : f32 to vector<8x128xf32>
    %464 = arith.subf %463, %462 : vector<8x128xf32>
    %cst_184 = arith.constant 0.000000e+00 : f32
    %465 = vector.broadcast %cst_184 : f32 to vector<8x128xf32>
    %466 = arith.select %278, %464, %465 : vector<8x128xi1>, vector<8x128xf32>
    %467 = arith.addf %204, %466 : vector<8x128xf32>
    %cst_185 = arith.constant 1.000000e+00 : f32
    %cst_186 = arith.constant 0.000000e+00 : f32
    %468 = vector.broadcast %cst_185 : f32 to vector<8x128xf32>
    %469 = vector.broadcast %cst_186 : f32 to vector<8x128xf32>
    %470 = arith.select %278, %468, %469 : vector<8x128xi1>, vector<8x128xf32>
    %471 = arith.addf %208, %470 : vector<8x128xf32>
    %472 = arith.mulf %283, %462 : vector<8x128xf32>
    %473 = arith.subf %291, %472 : vector<8x128xf32>
    %cst_187 = arith.constant 0.000000e+00 : f32
    %474 = vector.broadcast %cst_187 : f32 to vector<8x128xf32>
    %475 = arith.select %278, %473, %474 : vector<8x128xi1>, vector<8x128xf32>
    %476 = arith.addf %213, %475 : vector<8x128xf32>
    %c0_188 = arith.constant 0 : index
    %c5_189 = arith.constant 5 : index
    %477 = arith.index_cast %273 : i32 to index
    %c0_190 = arith.constant 0 : index
    %478 = vector.load %arg3[%c0_188, %c5_189, %477, %c0_190] : memref<1x7x16x128xf32, #tpu.memory_space<vmem>>, vector<1x1x8x128xf32>
    %479 = vector.shape_cast %478 : vector<1x1x8x128xf32> to vector<8x128xf32>
    %c0_191 = arith.constant 0 : index
    %c5_192 = arith.constant 5 : index
    %480 = arith.index_cast %273 : i32 to index
    %c0_193 = arith.constant 0 : index
    %481 = vector.load %arg2[%c0_191, %c5_192, %480, %c0_193] : memref<1x9x16x128xf32, #tpu.memory_space<vmem>>, vector<1x1x8x128xf32>
    %482 = vector.shape_cast %481 : vector<1x1x8x128xf32> to vector<8x128xf32>
    %c0_194 = arith.constant 0 : index
    %c6_195 = arith.constant 6 : index
    %483 = arith.index_cast %273 : i32 to index
    %c0_196 = arith.constant 0 : index
    %484 = vector.load %arg2[%c0_194, %c6_195, %483, %c0_196] : memref<1x9x16x128xf32, #tpu.memory_space<vmem>>, vector<1x1x8x128xf32>
    %485 = vector.shape_cast %484 : vector<1x1x8x128xf32> to vector<8x128xf32>
    %c0_197 = arith.constant 0 : index
    %c7_198 = arith.constant 7 : index
    %486 = arith.index_cast %273 : i32 to index
    %c0_199 = arith.constant 0 : index
    %487 = vector.load %arg2[%c0_197, %c7_198, %486, %c0_199] : memref<1x9x16x128xf32, #tpu.memory_space<vmem>>, vector<1x1x8x128xf32>
    %488 = vector.shape_cast %487 : vector<1x1x8x128xf32> to vector<8x128xf32>
    %c0_200 = arith.constant 0 : index
    %c8_201 = arith.constant 8 : index
    %489 = arith.index_cast %273 : i32 to index
    %c0_202 = arith.constant 0 : index
    %490 = vector.load %arg2[%c0_200, %c8_201, %489, %c0_202] : memref<1x9x16x128xf32, #tpu.memory_space<vmem>>, vector<1x1x8x128xf32>
    %491 = vector.shape_cast %490 : vector<1x1x8x128xf32> to vector<8x128xf32>
    %492 = arith.maximumf %482, %485 : vector<8x128xf32>
    %493 = arith.maximumf %492, %488 : vector<8x128xf32>
    %494 = arith.maximumf %493, %491 : vector<8x128xf32>
    %cst_203 = arith.constant 0.000000e+00 : f32
    %495 = vector.broadcast %cst_203 : f32 to vector<8x128xf32>
    %cst_204 = arith.constant 0.000000e+00 : f32
    %496 = vector.broadcast %cst_204 : f32 to vector<8x128xf32>
    %497 = arith.subf %482, %494 : vector<8x128xf32>
    %498 = math.exp %497 : vector<8x128xf32>
    %499 = arith.addf %495, %498 : vector<8x128xf32>
    %cst_205 = arith.constant 0.000000e+00 : f32
    %500 = vector.broadcast %cst_205 : f32 to vector<8x128xf32>
    %501 = arith.cmpf oeq, %479, %500 : vector<8x128xf32>
    %cst_206 = arith.constant 0.000000e+00 : f32
    %502 = vector.broadcast %cst_206 : f32 to vector<8x128xf32>
    %503 = arith.select %501, %482, %502 : vector<8x128xi1>, vector<8x128xf32>
    %504 = arith.addf %496, %503 : vector<8x128xf32>
    %505 = arith.subf %485, %494 : vector<8x128xf32>
    %506 = math.exp %505 : vector<8x128xf32>
    %507 = arith.addf %499, %506 : vector<8x128xf32>
    %cst_207 = arith.constant 1.000000e+00 : f32
    %508 = vector.broadcast %cst_207 : f32 to vector<8x128xf32>
    %509 = arith.cmpf oeq, %479, %508 : vector<8x128xf32>
    %cst_208 = arith.constant 0.000000e+00 : f32
    %510 = vector.broadcast %cst_208 : f32 to vector<8x128xf32>
    %511 = arith.select %509, %485, %510 : vector<8x128xi1>, vector<8x128xf32>
    %512 = arith.addf %504, %511 : vector<8x128xf32>
    %513 = arith.subf %488, %494 : vector<8x128xf32>
    %514 = math.exp %513 : vector<8x128xf32>
    %515 = arith.addf %507, %514 : vector<8x128xf32>
    %cst_209 = arith.constant 2.000000e+00 : f32
    %516 = vector.broadcast %cst_209 : f32 to vector<8x128xf32>
    %517 = arith.cmpf oeq, %479, %516 : vector<8x128xf32>
    %cst_210 = arith.constant 0.000000e+00 : f32
    %518 = vector.broadcast %cst_210 : f32 to vector<8x128xf32>
    %519 = arith.select %517, %488, %518 : vector<8x128xi1>, vector<8x128xf32>
    %520 = arith.addf %512, %519 : vector<8x128xf32>
    %521 = arith.subf %491, %494 : vector<8x128xf32>
    %522 = math.exp %521 : vector<8x128xf32>
    %523 = arith.addf %515, %522 : vector<8x128xf32>
    %cst_211 = arith.constant 3.000000e+00 : f32
    %524 = vector.broadcast %cst_211 : f32 to vector<8x128xf32>
    %525 = arith.cmpf oeq, %479, %524 : vector<8x128xf32>
    %cst_212 = arith.constant 0.000000e+00 : f32
    %526 = vector.broadcast %cst_212 : f32 to vector<8x128xf32>
    %527 = arith.select %525, %491, %526 : vector<8x128xi1>, vector<8x128xf32>
    %528 = arith.addf %520, %527 : vector<8x128xf32>
    %529 = math.log %523 : vector<8x128xf32>
    %530 = arith.addf %494, %529 : vector<8x128xf32>
    %531 = arith.subf %530, %528 : vector<8x128xf32>
    %cst_213 = arith.constant 0.000000e+00 : f32
    %532 = vector.broadcast %cst_213 : f32 to vector<8x128xf32>
    %533 = arith.select %278, %531, %532 : vector<8x128xi1>, vector<8x128xf32>
    %534 = arith.addf %271, %533 : vector<8x128xf32>
    %c2_i32 = arith.constant 2 : i32
    %cst_214 = arith.constant dense<0.000000e+00> : vector<128xf32>
    %535 = vector.multi_reduction <add>, %294, %cst_214 [0] : vector<8x128xf32> to vector<128xf32>
    %536 = vector.shape_cast %535 : vector<128xf32> to vector<1x128xf32>
    %c0_215 = arith.constant 0 : index
    %c0_216 = arith.constant 0 : index
    %c0_217 = arith.constant 0 : index
    %c0_218 = arith.constant 0 : index
    %537 = vector.load %arg5[%c0_215, %c0_216, %c0_217, %c0_218] : memref<1x1x8x128xf32, #tpu.memory_space<vmem>>, vector<1x1x1x128xf32>
    %538 = vector.shape_cast %537 : vector<1x1x1x128xf32> to vector<1x128xf32>
    %539 = vector.shape_cast %536 : vector<1x128xf32> to vector<1x1x1x128xf32>
    tpu.vector_store %arg5[%c0_215, %c0_216, %c0_217, %c0_218], %539 {strides = array<i32>} : memref<1x1x8x128xf32, #tpu.memory_space<vmem>>, vector<1x1x1x128xf32>,
    %cst_219 = arith.constant dense<0.000000e+00> : vector<128xf32>
    %540 = vector.multi_reduction <add>, %298, %cst_219 [0] : vector<8x128xf32> to vector<128xf32>
    %541 = vector.shape_cast %540 : vector<128xf32> to vector<1x128xf32>
    %c0_220 = arith.constant 0 : index
    %c0_221 = arith.constant 0 : index
    %c1_222 = arith.constant 1 : index
    %c0_223 = arith.constant 0 : index
    %542 = vector.load %arg5[%c0_220, %c0_221, %c1_222, %c0_223] : memref<1x1x8x128xf32, #tpu.memory_space<vmem>>, vector<1x1x1x128xf32>
    %543 = vector.shape_cast %542 : vector<1x1x1x128xf32> to vector<1x128xf32>
    %544 = vector.shape_cast %541 : vector<1x128xf32> to vector<1x1x1x128xf32>
    tpu.vector_store %arg5[%c0_220, %c0_221, %c1_222, %c0_223], %544 {strides = array<i32>} : memref<1x1x8x128xf32, #tpu.memory_space<vmem>>, vector<1x1x1x128xf32>,
    %cst_224 = arith.constant dense<0.000000e+00> : vector<128xf32>
    %545 = vector.multi_reduction <add>, %467, %cst_224 [0] : vector<8x128xf32> to vector<128xf32>
    %546 = vector.shape_cast %545 : vector<128xf32> to vector<1x128xf32>
    %c0_225 = arith.constant 0 : index
    %c0_226 = arith.constant 0 : index
    %c2_227 = arith.constant 2 : index
    %c0_228 = arith.constant 0 : index
    %547 = vector.load %arg5[%c0_225, %c0_226, %c2_227, %c0_228] : memref<1x1x8x128xf32, #tpu.memory_space<vmem>>, vector<1x1x1x128xf32>
    %548 = vector.shape_cast %547 : vector<1x1x1x128xf32> to vector<1x128xf32>
    %549 = vector.shape_cast %546 : vector<1x128xf32> to vector<1x1x1x128xf32>
    tpu.vector_store %arg5[%c0_225, %c0_226, %c2_227, %c0_228], %549 {strides = array<i32>} : memref<1x1x8x128xf32, #tpu.memory_space<vmem>>, vector<1x1x1x128xf32>,
    %cst_229 = arith.constant dense<0.000000e+00> : vector<128xf32>
    %550 = vector.multi_reduction <add>, %471, %cst_229 [0] : vector<8x128xf32> to vector<128xf32>
    %551 = vector.shape_cast %550 : vector<128xf32> to vector<1x128xf32>
    %c0_230 = arith.constant 0 : index
    %c0_231 = arith.constant 0 : index
    %c3_232 = arith.constant 3 : index
    %c0_233 = arith.constant 0 : index
    %552 = vector.load %arg5[%c0_230, %c0_231, %c3_232, %c0_233] : memref<1x1x8x128xf32, #tpu.memory_space<vmem>>, vector<1x1x1x128xf32>
    %553 = vector.shape_cast %552 : vector<1x1x1x128xf32> to vector<1x128xf32>
    %554 = vector.shape_cast %551 : vector<1x128xf32> to vector<1x1x1x128xf32>
    tpu.vector_store %arg5[%c0_230, %c0_231, %c3_232, %c0_233], %554 {strides = array<i32>} : memref<1x1x8x128xf32, #tpu.memory_space<vmem>>, vector<1x1x1x128xf32>,
    %cst_234 = arith.constant dense<0.000000e+00> : vector<128xf32>
    %555 = vector.multi_reduction <add>, %476, %cst_234 [0] : vector<8x128xf32> to vector<128xf32>
    %556 = vector.shape_cast %555 : vector<128xf32> to vector<1x128xf32>
    %c0_235 = arith.constant 0 : index
    %c0_236 = arith.constant 0 : index
    %c4_237 = arith.constant 4 : index
    %c0_238 = arith.constant 0 : index
    %557 = vector.load %arg5[%c0_235, %c0_236, %c4_237, %c0_238] : memref<1x1x8x128xf32, #tpu.memory_space<vmem>>, vector<1x1x1x128xf32>
    %558 = vector.shape_cast %557 : vector<1x1x1x128xf32> to vector<1x128xf32>
    %559 = vector.shape_cast %556 : vector<1x128xf32> to vector<1x1x1x128xf32>
    tpu.vector_store %arg5[%c0_235, %c0_236, %c4_237, %c0_238], %559 {strides = array<i32>} : memref<1x1x8x128xf32, #tpu.memory_space<vmem>>, vector<1x1x1x128xf32>,
    %cst_239 = arith.constant dense<0.000000e+00> : vector<128xf32>
    %560 = vector.multi_reduction <add>, %534, %cst_239 [0] : vector<8x128xf32> to vector<128xf32>
    %561 = vector.shape_cast %560 : vector<128xf32> to vector<1x128xf32>
    %c0_240 = arith.constant 0 : index
    %c0_241 = arith.constant 0 : index
    %c5_242 = arith.constant 5 : index
    %c0_243 = arith.constant 0 : index
    %562 = vector.load %arg5[%c0_240, %c0_241, %c5_242, %c0_243] : memref<1x1x8x128xf32, #tpu.memory_space<vmem>>, vector<1x1x1x128xf32>
    %563 = vector.shape_cast %562 : vector<1x1x1x128xf32> to vector<1x128xf32>
    %564 = vector.shape_cast %561 : vector<1x128xf32> to vector<1x1x1x128xf32>
    tpu.vector_store %arg5[%c0_240, %c0_241, %c5_242, %c0_243], %564 {strides = array<i32>} : memref<1x1x8x128xf32, #tpu.memory_space<vmem>>, vector<1x1x1x128xf32>,
    %cst_244 = arith.constant 0.000000e+00 : f32
    %565 = vector.broadcast %cst_244 : f32 to vector<2x128xf32>
    %c0_245 = arith.constant 0 : index
    %c0_246 = arith.constant 0 : index
    %c6_247 = arith.constant 6 : index
    %c0_248 = arith.constant 0 : index
    %566 = vector.load %arg5[%c0_245, %c0_246, %c6_247, %c0_248] : memref<1x1x8x128xf32, #tpu.memory_space<vmem>>, vector<1x1x2x128xf32>
    %567 = vector.shape_cast %566 : vector<1x1x2x128xf32> to vector<2x128xf32>
    %568 = vector.shape_cast %565 : vector<2x128xf32> to vector<1x1x2x128xf32>
    tpu.vector_store %arg5[%c0_245, %c0_246, %c6_247, %c0_248], %568 {strides = array<i32>} : memref<1x1x8x128xf32, #tpu.memory_space<vmem>>, vector<1x1x2x128xf32>,
    return
  }
  func.func @transform_0(%arg0: i32, %arg1: i32) -> (i32, i32, i32, i32) {
    %c0_i32 = arith.constant 0 : i32
    %c0_i32_0 = arith.constant 0 : i32
    %c0_i32_1 = arith.constant 0 : i32
    return %arg0, %c0_i32, %arg1, %c0_i32_0 : i32, i32, i32, i32
  }
  func.func @transform_1(%arg0: i32, %arg1: i32) -> (i32, i32, i32, i32) {
    %c0_i32 = arith.constant 0 : i32
    %c0_i32_0 = arith.constant 0 : i32
    %c0_i32_1 = arith.constant 0 : i32
    return %arg0, %c0_i32, %arg1, %c0_i32_0 : i32, i32, i32, i32
  }
  func.func @transform_2(%arg0: i32, %arg1: i32) -> (i32, i32, i32, i32) {
    %c0_i32 = arith.constant 0 : i32
    %c0_i32_0 = arith.constant 0 : i32
    %c0_i32_1 = arith.constant 0 : i32
    %c0_i32_2 = arith.constant 0 : i32
    return %arg0, %c0_i32, %c0_i32_0, %c0_i32_1 : i32, i32, i32, i32
  }
  func.func @transform_3(%arg0: i32, %arg1: i32) -> (i32, i32, i32, i32) {
    %c0_i32 = arith.constant 0 : i32
    %c0_i32_0 = arith.constant 0 : i32
    %c0_i32_1 = arith.constant 0 : i32
    return %arg0, %arg1, %c0_i32, %c0_i32_0 : i32, i32, i32, i32
  }
}

</mosaic_0001>

<bundles_post_ra>
// kernel: yolo_loss_pallas.1
= control target key start
LH: loop header
LB: loop body
LE: loop exit
PB: predicated region body
PF: predicated region fallthrough
CT: control target
= control target key end

     0   :  { %s1077_s12 = smov 0   ;;  %s1079_s13 = smov 0   ;;  %s1468_s0 = inlined_call_operand.vmem [shape: f32[3,9,16,128], index: 0, kind: input, shape index: {}]   ;;  %s1469_s1 = inlined_call_operand.vmem [shape: f32[3,7,16,128], index: 1, kind: input, shape index: {}]   ;;  %s1470_s2 = inlined_call_operand.vmem [shape: f32[3,2,1,128], index: 2, kind: input, shape index: {}]   ;;  %s1471_s3 = inlined_call_operand.vmem [shape: f32[3,1,8,128], index: 3, kind: output, shape index: {}]  }
   0x1   :  { %s1081_s14 = smov 0  }
   0x2 LB: > { %s25_s15 = sadd.s32 1, %s1049_s13  ;;  %p881_p0 = scmp.ge.s32.totalorder %s1053_s14, 1  ;;  %s1053_s14 = sphi %s1081_s14, %s13_s14   ;;  %s1049_s13 = sphi %s1079_s13, %s1477_s13   ;;  %s1045_s12 = sphi %s1077_s12, %s1476_s12  }
   0x3   : > { %p27_p1 = scmp.ge.s32.totalorder %s25_s15, 3  ;;  %p184_p2 = scmp.lt.s32.totalorder %s1053_s14, 4 }
   0x5   : > { %s1479_s15 = smov (%p27_p1, %s25_s15), 0  ;;  %p185_p3 = pnand %p881_p0, %p184_p2 }
   0x6   : > { %p228_p4 = scmp.lt.s32.totalorder (!%p185_p3), %s1045_s12, 2  ;;  %v1055_v5 = vmov (!%p185_p3), 0.0  }
   0x7   : > { %188 = sbr.rel (%p185_p3) target bundleno = 162 (0xa2), region = 32 }
   0xe   : > { %s1481_s12 = smov (!%p228_p4, %s1045_s12), 2 }
   0xf   : > { %s927_s16 = smul.u32 144, %s1481_s12  ;;  %s885_s21 = sshll.u32 %s1481_s12, 3 }
  0x10   : > { %s928_s17 = smul.u32 112, %s1481_s12  ;;  %s1113_s27 = scalar_lea.vmem %s1471_s3, %s885_s21 }
  0x11   : > { %s1102_s20 = scalar_lea.vmem %s1468_s0, %s927_s16  ;;  %741 = vst [vmem:[%s1113_s27 + $0x6] sm:$0x3] %v1055_v5  ;;  %s884_s28 = sshll.u32 %s1481_s12, 1 }
  0x12   : > { %s1108_s24 = scalar_lea.vmem %s1469_s1, %s928_s17  ;;  %v1116_v0 = vld [vmem:[%s1102_s20] sm:$0xff]  ;;  %v1119_v1 = vld [vmem:[%s1102_s20 + $0x8] sm:$0xff]  ;;  %v889_v6 = vld [vmem:[%s1102_s20 + $0x10] sm:$0xff]  ;;  %s1155_s4 = scalar_lea.vmem %s1470_s2, %s884_s28 }
  0x13   : > { %v1122_v2 = vld [vmem:[%s1108_s24] sm:$0xff]  ;;  %v278_v3 = vand.u32 2147483647, %v1116_v0  ;;  %v1126_v4 = vld [vmem:[%s1108_s24 + $0x8] sm:$0xff]  ;;  %v492_v9 = vand.u32 2147483647, %v1119_v1 }
  0x14   : > { %vm275_vm0 = vcmp.eq.f32.partialorder %v1122_v2, 0.0  ;;  %vm488_vm1 = vcmp.eq.f32.partialorder %v1126_v4, 0.0  ;;  %v890_v7 = vld [vmem:[%s1102_s20 + $0x20] sm:$0xff]  ;;  %v299_v13 = vsub.f32 0.0, %v889_v6  ;;  %vm274_vm2 = vcmp.eq.f32.partialorder %v1122_v2, 1.0  ;;  %v891_v25 = vld [vmem:[%s1102_s20 + $0x30] sm:$0xff] }
  0x15   : > { %v279_v8 = vsub.f32 0.0, %v278_v3  ;;  %v294_v10 = vsel %vm275_vm0, 1.0, %v1055_v5  ;;  %v508_v11 = vsel %vm488_vm1, 1.0, %v1055_v5  ;;  %v307_v14 = vsub.f32 0.0, %v890_v7  ;;  %v892_v15 = vld [vmem:[%s1102_s20 + $0x40] sm:$0xff]  ;;  %v908_v27 = vld [vmem:[%s1102_s20 + $0x18] sm:$0xff] }
  0x16   : > { %v509_v12 = vadd.f32 %v508_v11, %v294_v10  ;;  %v493_v17 = vsub.f32 0.0, %v492_v9  ;;  %v300_v19 = vmul.f32 1.442695, %v299_v13  ;;  %v321_v22 = vmul.f32 1.442695, %v892_v15  ;;  %v911_v28 = vld [vmem:[%s1102_s20 + $0x48] sm:$0xff] }
  0x17   : > { %v280_v16 = vmul.f32 1.442695, %v279_v8  ;;  %v308_v20 = vmul.f32 1.442695, %v307_v14  ;;  %vm487_vm3 = vcmp.eq.f32.partialorder %v1126_v4, 1.0  ;;  %v909_v29 = vld [vmem:[%s1102_s20 + $0x28] sm:$0xff] }
  0x18   : > { %v706_v18 = vrot.slane %v509_v12, 4  ;;  %v494_v21 = vmul.f32 1.442695, %v493_v17  ;;  %v315_v31 = vmul.f32 1.442695, %v891_v25  ;;  %v429_v32 = vsel %vm274_vm2, 1.0, %v1055_v5 }
  0x19   : > { %955 = vpow2.f32 %v280_v16  ;;  %v513_v33 = vsub.f32 0.0, %v908_v27  ;;  %v535_v34 = vmul.f32 1.442695, %v911_v28  ;;  %v521_v36 = vsub.f32 0.0, %v909_v29  ;;  %v888_v43 = vld [vmem:[%s1155_s4 + $0x1] ss:$0 sm:$0xff] }
  0x1a   : > { %v707_v23 = vadd.f32 %v706_v18, %v509_v12  ;;  %957 = vpow2.f32 %v300_v19  ;;  %v643_v37 = vsel %vm487_vm3, 1.0, %v1055_v5  ;;  %v1166_v3 = vld [vmem:[%s1108_s24 + $0x30] sm:$0xff]  ;;  %v277_v7 = vmax.f32 %v1116_v0, 0.0  ;;  %v1170_v9 = vld [vmem:[%s1155_s4] ss:$0 sm:$0xff]  ;;  %v910_v10 = vld [vmem:[%s1102_s20 + $0x38] sm:$0xff] }
  0x1b   : > { %959 = vpow2.f32 %v494_v21  ;;  %v644_v39 = vadd.f32 %v643_v37, %v429_v32  ;;  %v514_v44 = vmul.f32 1.442695, %v513_v33  ;;  %v522_v48 = vmul.f32 1.442695, %v521_v36  ;;  %v1179_v15 = vld [vmem:[%s1108_s24 + $0x40] sm:$0xff]  ;;  %v1182_v16 = vld [vmem:[%s1102_s20 + $0x50] sm:$0xff] }
  0x1c   : > { %v708_v24 = vrot.slane %v707_v23, 2  ;;  %961 = vpow2.f32 %v308_v20  ;;  %v491_v14 = vmax.f32 %v1119_v1, 0.0  ;;  %v1185_v17 = vld [vmem:[%s1102_s20 + $0x60] sm:$0xff]  ;;  %v341_v20 = vmul.f32 0.5, %v1166_v3  ;;  %v1209_v37 = vld [vmem:[%s1102_s20 + $0x70] sm:$0xff] }
  0x1d   : > { %963 = vpow2.f32 %v321_v22  ;;  %v720_v45 = vrot.slane %v644_v39, 4  ;;  %v529_v25 = vmul.f32 1.442695, %v910_v10 }
  0x1e   : > { %v709_v26 = vadd.f32 %v708_v24, %v707_v23  ;;  %965 = vpow2.f32 %v315_v31  ;;  %v448_v31 = vmax.f32 %v1182_v16, %v1185_v17 }
  0x1f   : > { %967 = vpow2.f32 %v535_v34  ;;  %v721_v54 = vadd.f32 %v720_v45, %v644_v39  ;;  %v893_v34 = vld [vmem:[%s1108_s24 + $0x10] sm:$0xff] }
  0x20   : > { %v710_v30 = vrot.slane %v709_v26, 1 }
  0x21   : > { %v722_v58 = vrot.slane %v721_v54, 2 }
  0x22   : > { %v711_v35 = vadd.f32 %v710_v30, %v709_v26  ;;  %v344_v30 = vmul.f32 0.5, %v1179_v15 }
  0x23   : > { %v956_v38 = vpop.eup %955  ;;  %v723_v61 = vadd.f32 %v722_v58, %v721_v54 }
  0x24   : > { %v958_v40 = vpop.eup %957  ;;  %v282_v41 = vadd.f32 1.0, %v956_v38  ;;  %712 = vst [vmem:[%s1113_s27 + $0x1] sm:$0x1] %v711_v35  ;;  %v285_v50 = vmul.f32 -0.5, %v956_v38  ;;  %v288_v59 = vand.u32 2147483647, %v956_v38 }
  0x25   : > { %v960_v42 = vpop.eup %959  ;;  %v302_v51 = vadd.f32 1.0, %v958_v40  ;;  %v724_v11 = vrot.slane %v723_v61, 1  ;;  %v894_v35 = vld [vmem:[%s1108_s24 + $0x20] sm:$0xff] }
  0x26   : > { %v962_v46 = vpop.eup %961  ;;  %969 = vlog2.f32 %v282_v41  ;;  %v496_v47 = vadd.f32 1.0, %v960_v42  ;;  %v499_v55 = vmul.f32 -0.5, %v960_v42  ;;  %v286_v57 = vadd.f32 1.0, %v285_v50 }
  0x27   : > { %v964_v49 = vpop.eup %963  ;;  %v310_v52 = vadd.f32 1.0, %v962_v46  ;;  %v502_v63 = vand.u32 2147483647, %v960_v42  ;;  %vm1173_vm4 = vcmp.lt.f32.partialorder %v288_v59, 0.0004427343  ;;  %v725_v21 = vadd.f32 %v724_v11, %v723_v61 }
  0x28   : > { %971 = vlog2.f32 %v496_v47  ;;  %v1162_v53 = vmul.f32 %v964_v49, %v888_v43  ;;  %v500_v60 = vadd.f32 1.0, %v499_v55  ;;  %v966_v62 = vpop.eup %965  ;;  %v287_v8 = vmul.f32 %v956_v38, %v286_v57  ;;  %v1235_v55 = vld [vmem:[%s1102_s20 + $0x80] sm:$0xff] }
  0x29   : > { %973 = vpow2.f32 %v514_v44  ;;  %v968_v6 = vpop.eup %967  ;;  %vm1188_vm5 = vcmp.lt.f32.partialorder %v502_v63, 0.0004427343  ;;  %v1193_v24 = vmul.f32 %v966_v62, %v1170_v9  ;;  %726 = vst [vmem:[%s1113_s27 + $0x3] sm:$0x1] %v725_v21  ;;  %v1220_v46 = vsub.f32 %v893_v34, %v341_v20 }
  0x2a   : > { %v383_v56 = vadd.f32 1e-07, %v1162_v53  ;;  %975 = vpow2.f32 %v522_v48  ;;  %v501_v19 = vmul.f32 %v960_v42, %v500_v60  ;;  %v1195_v26 = vmul.f32 %v968_v6, %v888_v43 }
  0x2b   : > { %977 = vrcp.f32 %v302_v51  ;;  %v335_v36 = vmul.f32 0.5, %v1193_v24  ;;  %v338_v40 = vmul.f32 0.5, %v1162_v53  ;;  %v1222_v47 = vadd.f32 %v893_v34, %v341_v20  ;;  %v912_v34 = vld [vmem:[%s1108_s24 + $0x18] sm:$0xff] }
  0x2c   : > { %979 = vrcp.f32 %v310_v52  ;;  %v597_v44 = vadd.f32 1e-07, %v1195_v26  ;;  %v1224_v48 = vsub.f32 %v894_v35, %v344_v30  ;;  %v449_v49 = vmax.f32 %v448_v31, %v1209_v37 }
  0x2d   : > { %981 = vrcp.f32 %v383_v56  ;;  %v1241_v59 = vadd.f32 %v894_v35, %v344_v30  ;;  %v915_v35 = vld [vmem:[%s1108_s24 + $0x48] sm:$0xff] }
  0x2e   : > { %983 = vpow2.f32 %v529_v25  ;;  %v1247_v63 = vmax.f32 %v449_v49, %v1235_v55  ;;  %v558_v49 = vmul.f32 0.5, %v915_v35 }
  0x2f   : > { %985 = vrcp.f32 %v597_v44 }
  0x30   : > { %v970_v12 = vpop.eup %969 }
  0x31   : > { %v284_v18 = vmul.f32 0.6931472, %v970_v12 }
  0x32   : > { %v972_v22 = vpop.eup %971 }
  0x33   : > { %v974_v27 = vpop.eup %973  ;;  %v290_v28 = vsel %vm1173_vm4, %v287_v8, %v284_v18  ;;  %v498_v29 = vmul.f32 0.6931472, %v972_v22  ;;  %v1262_v18 = vld [vmem:[%s1108_s24 + $0x50] sm:$0xff]  ;;  %v458_v22 = vsub.f32 %v1185_v17, %v1247_v63 }
  0x34   : > { %v976_v32 = vpop.eup %975  ;;  %v1203_v33 = vadd.f32 %v290_v28, %v277_v7  ;;  %v516_v54 = vadd.f32 1.0, %v974_v27  ;;  %vm455_vm6 = vcmp.eq.f32.partialorder %v1262_v18, 0.0  ;;  %vm462_vm7 = vcmp.eq.f32.partialorder %v1262_v18, 1.0 }
  0x35   : > { %v978_v38 = vpop.eup %977  ;;  %v504_v39 = vsel %vm1188_vm5, %v501_v19, %v498_v29  ;;  %v524_v61 = vadd.f32 1.0, %v976_v32  ;;  %v451_v19 = vsub.f32 %v1182_v16, %v1247_v63  ;;  %v357_v29 = vmul.f32 %v1179_v15, %v1166_v3 }
  0x36   : > { %v980_v41 = vpop.eup %979  ;;  %v292_v42 = vsel %vm275_vm0, %v1203_v33, 0.0  ;;  %v1217_v43 = vadd.f32 %v504_v39, %v491_v14  ;;  %v1230_v51 = vsub.f32 %v978_v38, %v335_v36  ;;  %v1232_v52 = vadd.f32 %v978_v38, %v335_v36  ;;  %v914_v14 = vld [vmem:[%s1108_s24 + $0x38] sm:$0xff] }
  0x37   : > { %v982_v45 = vpop.eup %981  ;;  %v1237_v57 = vsub.f32 %v980_v41, %v338_v40  ;;  %v1239_v58 = vadd.f32 %v980_v41, %v338_v40  ;;  %987 = vrcp.f32 %v516_v54  ;;  %v555_v30 = vmul.f32 0.5, %v914_v14  ;;  %v913_v54 = vld [vmem:[%s1108_s24 + $0x28] sm:$0xff] }
  0x38   : > { %v506_v50 = vsel %vm488_vm1, %v1217_v43, 0.0  ;;  %v1244_v60 = vmul.f32 %v982_v45, %v1193_v24  ;;  %v347_v6 = vmin.f32 %v1232_v52, %v1222_v47  ;;  %v348_v7 = vmax.f32 %v1230_v51, %v1220_v46  ;;  %v984_v20 = vpop.eup %983 }
  0x39   : > { %v507_v56 = vadd.f32 %v506_v50, %v292_v42  ;;  %v351_v10 = vmin.f32 %v1239_v58, %v1241_v59  ;;  %v352_v11 = vmax.f32 %v1237_v57, %v1224_v48  ;;  %989 = vrcp.f32 %v524_v61  ;;  %v986_v38 = vpop.eup %985 }
  0x3a   : > { %v1258_v12 = vand.u32 2147483647, %v1244_v60  ;;  %v349_v25 = vsub.f32 %v347_v6, %v348_v7  ;;  %v531_v32 = vmul.f32 %v984_v20, %v1170_v9  ;;  %v452_v36 = vmul.f32 1.442695, %v451_v19 }
  0x3b   : > { %v699_v62 = vrot.slane %v507_v56, 4  ;;  %v353_v27 = vsub.f32 %v351_v10, %v352_v11  ;;  %v356_v39 = vmul.f32 %v1162_v53, %v1193_v24  ;;  %v459_v40 = vmul.f32 1.442695, %v458_v22 }
  0x3c   : > { %v397_v21 = vadd.f32 1.0, %v1258_v12  ;;  %v393_v28 = vmax.f32 %v1258_v12, 1e-30  ;;  %v465_v3 = vsub.f32 %v1209_v37, %v1247_v63  ;;  %v350_v41 = vmax.f32 %v349_v25, 0.0 }
  0x3d   : > { %v700_v8 = vadd.f32 %v699_v62, %v507_v56  ;;  %v354_v42 = vmax.f32 %v353_v27, 0.0  ;;  %v549_v44 = vmul.f32 0.5, %v531_v32  ;;  %v1281_v45 = vsub.f32 %v912_v34, %v555_v30 }
  0x3e   : > { %991 = vrcp.f32 %v393_v28  ;;  %v1283_v50 = vmul.f32 %v915_v35, %v914_v14  ;;  %v552_v53 = vmul.f32 0.5, %v1195_v26  ;;  %v1288_v24 = vadd.f32 %v912_v34, %v555_v30  ;;  %v922_v34 = vld [vmem:[%s1102_s20 + $0x68] sm:$0xff] }
  0x3f   : > { %v701_v13 = vrot.slane %v700_v8, 2  ;;  %993 = vrcp.f32 %v397_v21  ;;  %v1290_v56 = vmul.f32 %v986_v38, %v531_v32  ;;  %v456_v62 = vsel %vm455_vm6, %v1182_v16, 0.0 }
  0x40   : > { %995 = vpow2.f32 %v452_v36  ;;  %v463_v6 = vsel %vm462_vm7, %v1185_v17, 0.0  ;;  %v466_v7 = vmul.f32 1.442695, %v465_v3  ;;  %v1298_v10 = vadd.f32 %v357_v29, %v356_v39  ;;  %v920_v39 = vld [vmem:[%s1108_s24 + $0x58] sm:$0xff] }
  0x41   : > { %v702_v23 = vadd.f32 %v701_v13, %v700_v8  ;;  %v988_v9 = vpop.eup %987  ;;  %997 = vpow2.f32 %v459_v40  ;;  %v1296_v8 = vmul.f32 %v354_v42, %v350_v41  ;;  %v1301_v11 = vand.u32 2147483647, %v1290_v56 }
  0x42   : > { %vm469_vm8 = vcmp.eq.f32.partialorder %v1262_v18, 2.0  ;;  %v1304_v13 = vsub.f32 %v988_v9, %v549_v44  ;;  %v1306_v14 = vadd.f32 %v988_v9, %v549_v44  ;;  %v1308_v19 = vsub.f32 %v913_v54, %v558_v49 }
  0x43   : > { %v703_v31 = vrot.slane %v702_v23, 1  ;;  %v990_v61 = vpop.eup %989  ;;  %v1310_v16 = vadd.f32 %v913_v54, %v558_v49  ;;  %v898_v17 = vadd.f32 -1.0, %v1258_v12  ;;  %v464_v21 = vadd.f32 %v463_v6, %v456_v62 }
  0x44   : > { %v1313_v20 = vadd.f32 %v990_v61, %v552_v53  ;;  %v472_v22 = vsub.f32 %v1235_v55, %v1247_v63  ;;  %v607_v25 = vmax.f32 %v1301_v11, 1e-30  ;;  %999 = vpow2.f32 %v466_v7 }
  0x45   : > { %v704_v15 = vadd.f32 %v703_v31, %v702_v23  ;;  %v1317_v23 = vsub.f32 %v990_v61, %v552_v53  ;;  %v470_v27 = vsel %vm469_vm8, %v1209_v37, 0.0  ;;  %v359_v29 = vsub.f32 %v1298_v10, %v1296_v8  ;;  %v921_v31 = vld [vmem:[%s1102_s20 + $0x58] sm:$0xff]  ;;  %v924_v53 = vld [vmem:[%s1102_s20 + $0x88] sm:$0xff] }
  0x46   : > { %vm389_vm9 = vcmp.gt.f32.partialorder %v1258_v12, 2.4142137  ;;  %vm390_vm10 = vcmp.gt.f32.partialorder %v1258_v12, 0.41421357  ;;  %v1326_v30 = vmul.f32 %v1195_v26, %v531_v32  ;;  %v561_v38 = vmin.f32 %v1306_v14, %v1288_v24 }
  0x47   : > { %705 = vst [vmem:[%s1113_s27] sm:$0x1] %v704_v15  ;;  %v562_v37 = vmax.f32 %v1304_v13, %v1281_v45  ;;  %1001 = vrcp.f32 %v607_v25  ;;  %v565_v3 = vmin.f32 %v1313_v20, %v1310_v16  ;;  %v611_v26 = vadd.f32 1.0, %v1301_v11  ;;  %v923_v15 = vld [vmem:[%s1102_s20 + $0x78] sm:$0xff] }
  0x48   : > { %v992_v28 = vpop.eup %991  ;;  %v471_v32 = vadd.f32 %v470_v27, %v464_v21  ;;  %v566_v41 = vmax.f32 %v1317_v23, %v1308_v19  ;;  %v473_v42 = vmul.f32 1.442695, %v472_v22  ;;  %vm476_vm11 = vcmp.eq.f32.partialorder %v1262_v18, 3.0 }
  0x49   : > { %v994_v35 = vpop.eup %993  ;;  %v395_v36 = vmul.f32 -1.0, %v992_v28  ;;  %v662_v9 = vmax.f32 %v921_v31, %v922_v34  ;;  %1003 = vrcp.f32 %v611_v26  ;;  %v477_v54 = vsel %vm476_vm11, %v1235_v55, 0.0 }
  0x4a   : > { %v399_v40 = vmul.f32 %v994_v35, %v898_v17  ;;  %v996_v44 = vpop.eup %995  ;;  %vm669_vm12 = vcmp.eq.f32.partialorder %v920_v39, 0.0  ;;  %1005 = vpow2.f32 %v473_v42  ;;  %v1351_v6 = vadd.f32 %v477_v54, %v471_v32 }
  0x4b   : > { %v998_v61 = vpop.eup %997  ;;  %v663_v18 = vmax.f32 %v662_v9, %v923_v15  ;;  %v563_v10 = vsub.f32 %v561_v38, %v562_v37  ;;  %v670_v17 = vsel %vm669_vm12, %v921_v31, 0.0  ;;  %vm676_vm13 = vcmp.eq.f32.partialorder %v920_v39, 1.0 }
  0x4c   : > { %v400_v49 = vsel %vm390_vm10, %v399_v40, %v1258_v12  ;;  %v677_v55 = vsel %vm676_vm13, %v922_v34, 0.0  ;;  %vm683_vm14 = vcmp.eq.f32.partialorder %v920_v39, 2.0  ;;  %vm690_vm15 = vcmp.eq.f32.partialorder %v920_v39, 3.0 }
  0x4d   : > { %v1349_v62 = vsel %vm389_vm9, %v395_v36, %v400_v49  ;;  %v1355_v21 = vmax.f32 %v663_v18, %v924_v53  ;;  %v461_v25 = vadd.f32 %v998_v61, %v996_v44  ;;  %v678_v27 = vadd.f32 %v677_v55, %v670_v17 }
  0x4e   : > { %v402_v7 = vmul.f32 %v1349_v62, %v1349_v62  ;;  %v684_v28 = vsel %vm683_vm14, %v923_v15, 0.0  ;;  %v1000_v35 = vpop.eup %999  ;;  %v917_v32 = vadd.f32 -1.0, %v1301_v11  ;;  %v691_v9 = vsel %vm690_vm15, %v924_v53, 0.0 }
  0x4f   : > { %v665_v36 = vsub.f32 %v921_v31, %v1355_v21  ;;  %v672_v40 = vsub.f32 %v922_v34, %v1355_v21  ;;  %v679_v26 = vsub.f32 %v923_v15, %v1355_v21  ;;  %v686_v38 = vsub.f32 %v924_v53, %v1355_v21 }
  0x50   : > { %v403_v22 = vmul.f32 0.080537446, %v402_v7  ;;  %v685_v42 = vadd.f32 %v684_v28, %v678_v27  ;;  %v567_v39 = vsub.f32 %v565_v3, %v566_v41  ;;  %v468_v17 = vadd.f32 %v1000_v35, %v461_v25 }
  0x51   : > { %v1002_v49 = vpop.eup %1001  ;;  %v666_v54 = vmul.f32 1.442695, %v665_v36  ;;  %v673_v44 = vmul.f32 1.442695, %v672_v40  ;;  %v680_v61 = vmul.f32 1.442695, %v679_v26  ;;  %v363_v15 = vmax.f32 %v1232_v52, %v1222_v47 }
  0x52   : > { %v899_v37 = vadd.f32 -0.13877685, %v403_v22  ;;  %v687_v55 = vmul.f32 1.442695, %v686_v38  ;;  %v1362_v31 = vadd.f32 %v691_v9, %v685_v42  ;;  %v360_v34 = vadd.f32 1e-07, %v359_v29 }
  0x53   : > { %v364_v22 = vmin.f32 %v1230_v51, %v1220_v46  ;;  %1007 = vpow2.f32 %v666_v54  ;;  %v1004_v27 = vpop.eup %1003  ;;  %vm604_vm0 = vcmp.gt.f32.partialorder %v1301_v11, 0.41421357  ;;  %v609_v3 = vmul.f32 -1.0, %v1002_v49 }
  0x54   : > { %v405_v18 = vmul.f32 %v899_v37, %v402_v7  ;;  %1009 = vpow2.f32 %v673_v44  ;;  %v1006_v41 = vpop.eup %1005  ;;  %v564_v28 = vmax.f32 %v563_v10, 0.0  ;;  %vm603_vm1 = vcmp.gt.f32.partialorder %v1301_v11, 2.4142137 }
  0x55   : > { %v613_v25 = vmul.f32 %v1004_v27, %v917_v32  ;;  %1011 = vpow2.f32 %v680_v61  ;;  %v568_v35 = vmax.f32 %v567_v39, 0.0  ;;  %v475_v36 = vadd.f32 %v1006_v41, %v468_v17 }
  0x56   : > { %v406_v53 = vadd.f32 0.19977711, %v405_v18  ;;  %1013 = vpow2.f32 %v687_v55  ;;  %v366_v40 = vmax.f32 %v1239_v58, %v1241_v59  ;;  %v367_v26 = vmin.f32 %v1237_v57, %v1224_v48 }
  0x57   : > { %v614_v38 = vsel %vm604_vm0, %v613_v25, %v1301_v11  ;;  %1015 = vlog2.f32 %v475_v36  ;;  %v572_v32 = vadd.f32 %v1283_v50, %v1326_v30  ;;  %v365_v9 = vsub.f32 %v363_v15, %v364_v22  ;;  %v897_v25 = vld [vmem:[%s1108_s24 + $0x60] sm:$0xff] }
  0x58   : > { %v407_v29 = vmul.f32 %v406_v53, %v402_v7  ;;  %v1379_v10 = vsel %vm603_vm1, %v609_v3, %v614_v38  ;;  %1017 = vrcp.f32 %v360_v34  ;;  %v391_v49 = vsel %vm390_vm10, 0.7853982, %v1055_v5 }
  0x59   : > { %v616_v42 = vmul.f32 %v1379_v10, %v1379_v10  ;;  %v1388_v54 = vmul.f32 %v568_v35, %v564_v28  ;;  %v368_v44 = vsub.f32 %v366_v40, %v367_v26  ;;  %vm386_vm4 = vcmp.lt.f32.partialorder %v1244_v60, 0.0 }
  0x5a   : > { %v900_v37 = vadd.f32 -0.3333295, %v407_v29  ;;  %v373_v50 = vadd.f32 %v1222_v47, %v1220_v46  ;;  %v392_v30 = vsel %vm389_vm9, 1.5707964, %v391_v49  ;;  %v369_v15 = vmul.f32 %v365_v9, %v365_v9 }
  0x5b   : > { %v617_v61 = vmul.f32 0.080537446, %v616_v42  ;;  %v573_v60 = vsub.f32 %v572_v32, %v1388_v54  ;;  %v370_v53 = vmul.f32 %v368_v44, %v368_v44  ;;  %v1056_v3 = vmov 1.0  }
  0x5c   : > { %v409_v39 = vmul.f32 %v900_v37, %v402_v7  ;;  %v377_v7 = vadd.f32 %v1241_v59, %v1224_v48  ;;  %v387_v41 = vsel %vm386_vm4, -1.0, %v1056_v3  ;;  %v374_v40 = vsub.f32 %v373_v50, %v1230_v51 }
  0x5d   : > { %v1008_v17 = vpop.eup %1007  ;;  %v918_v55 = vadd.f32 -0.13877685, %v617_v61  ;;  %v371_v38 = vadd.f32 %v370_v53, %v369_v15  ;;  %v578_v44 = vmin.f32 %v1304_v13, %v1281_v45  ;;  %v580_v61 = vmax.f32 %v1313_v20, %v1310_v16 }
  0x5e   : > { %v410_v18 = vmul.f32 %v409_v39, %v1349_v62  ;;  %v1010_v34 = vpop.eup %1009  ;;  %v378_v48 = vsub.f32 %v377_v7, %v1237_v57  ;;  %v577_v39 = vmax.f32 %v1306_v14, %v1288_v24  ;;  %v581_v51 = vmin.f32 %v1317_v23, %v1308_v19 }
  0x5f   : > { %v1012_v27 = vpop.eup %1011  ;;  %v619_v28 = vmul.f32 %v918_v55, %v616_v42  ;;  %v675_v46 = vadd.f32 %v1010_v34, %v1008_v17  ;;  %v605_v55 = vsel %vm604_vm0, 0.7853982, %v1055_v5  ;;  %v375_v7 = vsub.f32 %v374_v40, %v1232_v52 }
  0x60   : > { %v411_v22 = vadd.f32 %v410_v18, %v1349_v62  ;;  %v1014_v47 = vpop.eup %1013  ;;  %v574_v62 = vadd.f32 1e-07, %v573_v60  ;;  %vm600_vm5 = vcmp.lt.f32.partialorder %v1290_v56, 0.0  ;;  %v606_v5 = vsel %vm603_vm1, 1.5707964, %v605_v55 }
  0x61   : > { %v620_v29 = vadd.f32 0.19977711, %v619_v28  ;;  %v682_v35 = vadd.f32 %v1012_v27, %v675_v46  ;;  %v1016_v36 = vpop.eup %1015  ;;  %v582_v27 = vsub.f32 %v580_v61, %v581_v51  ;;  %v587_v56 = vadd.f32 %v1288_v24, %v1281_v45 }
  0x62   : > { %v412_v12 = vadd.f32 %v411_v22, %v392_v30  ;;  %v1018_v26 = vpop.eup %1017  ;;  %v480_v32 = vmul.f32 0.6931472, %v1016_v36  ;;  %v372_v30 = vadd.f32 1e-07, %v371_v38  ;;  %v379_v22 = vsub.f32 %v378_v48, %v1239_v58 }
  0x63   : > { %v621_v37 = vmul.f32 %v620_v29, %v616_v42  ;;  %v689_v9 = vadd.f32 %v1014_v47, %v682_v35  ;;  %v1413_v17 = vmul.f32 %v1018_v26, %v1296_v8  ;;  %v601_v58 = vsel %vm600_vm5, -1.0, %v1056_v3 }
  0x64   : > { %v413_v59 = vmul.f32 %v412_v12, %v387_v41  ;;  %v481_v18 = vadd.f32 %v480_v32, %v1247_v63  ;;  %v579_v63 = vsub.f32 %v577_v39, %v578_v44  ;;  %v380_v52 = vmul.f32 %v379_v22, %v379_v22  ;;  %v916_v12 = vld [vmem:[%s1108_s24 + $0x68] sm:$0xff] }
  0x65   : > { %v919_v57 = vadd.f32 -0.3333295, %v621_v37  ;;  %1019 = vlog2.f32 %v689_v9  ;;  %v584_v46 = vmul.f32 %v582_v27, %v582_v27  ;;  %v588_v3 = vsub.f32 %v587_v56, %v1304_v13 }
  0x66   : > { %v414_v49 = vsub.f32 %v897_v25, %v413_v59  ;;  %1021 = vrcp.f32 %v574_v62  ;;  %v482_v15 = vsub.f32 %v481_v18, %v1351_v6  ;;  %v583_v28 = vmul.f32 %v579_v63, %v579_v63 }
  0x67   : > { %v623_v34 = vmul.f32 %v919_v57, %v616_v42  ;;  %1023 = vrcp.f32 %v372_v30  ;;  %v376_v42 = vmul.f32 %v375_v7, %v375_v7  ;;  %v591_v25 = vadd.f32 %v1310_v16, %v1308_v19 }
  0x68   : > { %v415_v50 = vmul.f32 %v414_v49, %v414_v49  ;;  %v585_v40 = vadd.f32 %v584_v46, %v583_v28  ;;  %v483_v24 = vsel %vm274_vm2, %v482_v15, 0.0  ;;  %v589_v9 = vsub.f32 %v588_v3, %v1306_v14 }
  0x69   : > { %v624_v8 = vmul.f32 %v623_v34, %v1379_v10  ;;  %v381_v36 = vadd.f32 %v380_v52, %v376_v42  ;;  %v592_v59 = vsub.f32 %v591_v25, %v1317_v23 }
  0x6a   : > { %v416_v60 = vmul.f32 0.40528473, %v415_v50  ;;  %v586_v37 = vadd.f32 1e-07, %v585_v40 }
  0x6b   : > { %v625_v6 = vadd.f32 %v624_v8, %v1379_v10  ;;  %v382_v45 = vmul.f32 0.25, %v381_v36  ;;  %v593_v13 = vsub.f32 %v592_v59, %v1313_v20 }
  0x6c   : > { %v417_v53 = vsub.f32 %v416_v60, %v1413_v17 }
  0x6d   : > { %v626_v47 = vadd.f32 %v625_v6, %v606_v5  ;;  %v594_v57 = vmul.f32 %v593_v13, %v593_v13 }
  0x6e   : > { %v418_v41 = vadd.f32 1.0000001, %v417_v53 }
  0x6f   : > { %v1020_v11 = vpop.eup %1019  ;;  %v627_v29 = vmul.f32 %v626_v47, %v601_v58 }
  0x70   : > { %1025 = vrcp.f32 %v418_v41  ;;  %v1022_v35 = vpop.eup %1021  ;;  %v694_v10 = vmul.f32 0.6931472, %v1020_v11 }
  0x71   : > { %v628_v48 = vsub.f32 %v916_v12, %v627_v29  ;;  %v576_v26 = vmul.f32 %v1022_v35, %v1388_v54  ;;  %v1024_v16 = vpop.eup %1023  ;;  %1027 = vrcp.f32 %v586_v37 }
  0x72   : > { %v695_v62 = vadd.f32 %v694_v10, %v1355_v21  ;;  %v422_v39 = vmul.f32 %v1024_v16, %v382_v45 }
  0x73   : > { %v629_v38 = vmul.f32 %v628_v48, %v628_v48 }
  0x74   : > { %v696_v19 = vsub.f32 %v695_v62, %v1362_v31  ;;  %v590_v31 = vmul.f32 %v589_v9, %v589_v9 }
  0x75   : > { %v630_v32 = vmul.f32 0.40528473, %v629_v38 }
  0x76   : > { %v697_v23 = vsel %vm487_vm3, %v696_v19, 0.0  ;;  %v595_v20 = vadd.f32 %v594_v57, %v590_v31 }
  0x77   : > { %v631_v21 = vsub.f32 %v630_v32, %v576_v26  ;;  %v698_v49 = vadd.f32 %v697_v23, %v483_v24 }
  0x78   : > { %v596_v7 = vmul.f32 0.25, %v595_v20 }
  0x79   : > { %v632_v61 = vadd.f32 1.0000001, %v631_v21  ;;  %v734_v51 = vrot.slane %v698_v49, 4 }
  0x7a   : > { %v1026_v54 = vpop.eup %1025 }
  0x7b   : > { %v420_v44 = vmul.f32 %v1026_v54, %v416_v60  ;;  %1029 = vrcp.f32 %v632_v61  ;;  %v735_v50 = vadd.f32 %v734_v51, %v698_v49  ;;  %v1028_v22 = vpop.eup %1027 }
  0x7c   : > { %v636_v53 = vmul.f32 %v1028_v22, %v596_v7 }
  0x7d   : > { %v423_v18 = vmul.f32 %v420_v44, %v416_v60  ;;  %v736_v30 = vrot.slane %v735_v50, 2 }
  0x7f   : > { %v424_v14 = vadd.f32 %v423_v18, %v422_v39  ;;  %v737_v34 = vadd.f32 %v736_v30, %v735_v50 }
  0x81   : > { %v425_v55 = vsub.f32 %v1413_v17, %v424_v14  ;;  %v738_v15 = vrot.slane %v737_v34, 1 }
  0x83   : > { %v739_v63 = vadd.f32 %v738_v15, %v737_v34  ;;  %v431_v6 = vmul.f32 %v425_v55, %v1116_v0  ;;  %v426_v60 = vsub.f32 1.0, %v425_v55 }
  0x85   : > { %v1030_v27 = vpop.eup %1029  ;;  %740 = vst [vmem:[%s1113_s27 + $0x5] sm:$0x1] %v739_v63  ;;  %v432_v41 = vsub.f32 %v1203_v33, %v431_v6  ;;  %v427_v17 = vsel %vm274_vm2, %v426_v60, 0.0 }
  0x86   : > { %v634_v8 = vmul.f32 %v1030_v27, %v630_v32 }
  0x87   : > { %v433_v47 = vsel %vm274_vm2, %v432_v41, 0.0 }
  0x88   : > { %v637_v5 = vmul.f32 %v634_v8, %v630_v32 }
  0x8a   : > { %v638_v42 = vadd.f32 %v637_v5, %v636_v53 }
  0x8c   : > { %v639_v52 = vsub.f32 %v576_v26, %v638_v42 }
  0x8e   : > { %v640_v58 = vsub.f32 1.0, %v639_v52  ;;  %v645_v28 = vmul.f32 %v1119_v1, %v639_v52 }
  0x90   : > { %v641_v46 = vsel %vm487_vm3, %v640_v58, 0.0  ;;  %v646_v0 = vsub.f32 %v1217_v43, %v645_v28 }
  0x91   : > { %v642_v12 = vadd.f32 %v641_v46, %v427_v17 }
  0x92   : > { %v647_v33 = vsel %vm487_vm3, %v646_v0, 0.0 }
  0x93   : > { %v713_v56 = vrot.slane %v642_v12, 4  ;;  %v648_v25 = vadd.f32 %v647_v33, %v433_v47 }
  0x95   : > { %v714_v11 = vadd.f32 %v713_v56, %v642_v12  ;;  %v727_v29 = vrot.slane %v648_v25, 4 }
  0x97   : > { %v715_v35 = vrot.slane %v714_v11, 2  ;;  %v728_v1 = vadd.f32 %v727_v29, %v648_v25 }
  0x99   : > { %v716_v36 = vadd.f32 %v715_v35, %v714_v11  ;;  %v729_v10 = vrot.slane %v728_v1, 2 }
  0x9b   : > { %v717_v40 = vrot.slane %v716_v36, 1  ;;  %v730_v48 = vadd.f32 %v729_v10, %v728_v1 }
  0x9d   : > { %v718_v2 = vadd.f32 %v717_v40, %v716_v36  ;;  %v731_v3 = vrot.slane %v730_v48, 1 }
  0x9f   : > { %719 = vst [vmem:[%s1113_s27 + $0x2] sm:$0x1] %v718_v2  ;;  %v732_v59 = vadd.f32 %v731_v3, %v730_v48 }
  0xa1   : > { %733 = vst [vmem:[%s1113_s27 + $0x4] sm:$0x1] %v732_v59 }
  0xa2 PF: > { %s13_s14 = sadd.s32 1, %s1053_s14   ;;  %s1476_s12 = smov %s1049_s13 }
  0xa3   : > { %p10_p5 = scmp.ge.s32.totalorder %s13_s14, 5   ;;  %s1477_s13 = smov %s1479_s15 }
  0xa5   :  { %12 = sbr.rel (!%p10_p5) target bundleno = 2 (0x2), region = 99 }

</bundles_post_ra>
